<compile_context>
chip_gen: v5e
topology: v5e:2x2
jax: 0.10.0
libtpu: 0.0.40
codegen_flags: <defaults>
</compile_context>

<pallas_src>
import numpy as np

import jax
import jax.numpy as jnp
from jax import lax
from jax.experimental import pallas as pl
from jax.experimental.pallas import tpu as pltpu

LEAKY_SLOPE = 0.01   # nn.LeakyReLU default
BN_EPS = 1e-5        # nn.BatchNorm2d default
KH = KW = 5
CIN_PAD = 8          # pad first-layer channels 4 -> 8 so W*Cin = 128 (lane-dense)


# ----------------------------- fused Pallas kernel ------------------------------

def _leaky(y):
    return jnp.where(y >= 0, y, LEAKY_SLOPE * y)


def _cnn_fused_kernel(x_ref,
                      w1_ref, s1_ref, b1_ref,
                      w2_ref, s2_ref, b2_ref,
                      w3_ref, s3_ref, b3_ref,
                      fc1w_ref, fc1b_ref,
                      fc2w_ref, fc2b_ref,
                      o_ref):
    """Whole CNN forward for one batch block; activations stay in VMEM as bf16
    (N, H, W*C) slabs whose lane dims are always multiples of 128.

    x_ref:     (bn, H, Wpad*Cin)                   bf16
    w{l}_ref:  (KH*Win_pad*Cin, Wout_pad*Cout)     bf16  (dy-major block-Toeplitz)
    s{l}/b{l}: (1, Wout_pad*Cout)                  f32   (folded BN scale/shift)
    fc1w_ref:  (H3, W3_pad*C3, 128) bf16, fc1b_ref: (1, 128) f32
    fc2w_ref:  (128, n_classes) bf16,     fc2b_ref: (1, n_classes) f32
    o_ref:     (bn, n_classes)                     f32
    """

    def conv_bn_lrelu(x, w_ref, s_ref, b_ref):
        # x: (n, h_in, k) bf16.  One matmul for the whole layer: the LHS is the
        # lane-axis concat of the KH H-shifted slices (im2col over dy only).
        n, h_in, k = x.shape
        ho = h_in - (KH - 1)
        m = w_ref.shape[1]
        lhs = jnp.concatenate([x[:, dy:dy + ho, :] for dy in range(KH)], axis=-1)
        lhs = lhs.reshape(n * ho, KH * k)            # single (N,Ho)->(N*Ho) collapse
        acc = jnp.dot(lhs, w_ref[...], preferred_element_type=jnp.float32)
        y = _leaky(acc * s_ref[...] + b_ref[...])    # f32 BN + LeakyReLU epilogue
        return y.astype(jnp.bfloat16).reshape(n, ho, m)

    x = x_ref[...]                                   # (bn, H, Wpad*Cin) bf16
    n = x.shape[0]
    x = conv_bn_lrelu(x, w1_ref, s1_ref, b1_ref)     # (bn, 12, 128)
    x = conv_bn_lrelu(x, w2_ref, s2_ref, b2_ref)     # (bn,  8, 128)
    x = conv_bn_lrelu(x, w3_ref, s3_ref, b3_ref)     # (bn,  4, 128)

    # fc1: H3 accumulated (bn,128)x(128,128) dots -- avoids folding (H3, W3*C) into
    # the lane axis (a sublane->lane repack) on the serial path.  fc1 rows were
    # permuted host-side so this matches torch's NCHW flatten exactly.
    h3 = x.shape[1]
    acc = jnp.dot(x[:, 0, :], fc1w_ref[0], preferred_element_type=jnp.float32)
    for i in range(1, h3):
        acc = acc + jnp.dot(x[:, i, :], fc1w_ref[i],
                            preferred_element_type=jnp.float32)
    h = _leaky(acc + fc1b_ref[...])
    out = jnp.dot(h.astype(jnp.bfloat16), fc2w_ref[...],
                  preferred_element_type=jnp.float32) + fc2b_ref[...]
    o_ref[...] = out.astype(o_ref.dtype)


def _pinned_spec(shape):
    zeros = (0,) * len(shape)
    return pl.BlockSpec(shape, lambda i, z=zeros: z)   # same block every grid step


def _pick_batch_block(n, target=32):
    if n <= target:
        return n
    for bn in range(target, 7, -1):                    # prefer a multiple-of-8 divisor
        if n % bn == 0 and bn % 8 == 0:
            return bn
    return n


def cnn_forward(params, x_nchw):
    n, c, h, w = x_nchw.shape
    cin_pad = params["conv0_w"].shape[0] // (KH * w)
    n_classes = params["fc2_b"].shape[1]

    # NCHW -> (N, H, W*Cpad) bf16 slab: channels on the lane axis, zero-padded so the
    # first-layer contraction is lane-dense (128 per row).  Tiny host-side op.
    x = jnp.transpose(x_nchw, (0, 2, 3, 1))
    if cin_pad > c:
        x = jnp.pad(x, ((0, 0), (0, 0), (0, 0), (0, cin_pad - c)))
    x = x.reshape(n, h, w * cin_pad).astype(jnp.bfloat16)

    weight_args = (
        params["conv0_w"], params["conv0_scale"], params["conv0_shift"],
        params["conv1_w"], params["conv1_scale"], params["conv1_shift"],
        params["conv2_w"], params["conv2_scale"], params["conv2_shift"],
        params["fc1_w"], params["fc1_b"],
        params["fc2_w"], params["fc2_b"])

    bn = _pick_batch_block(n)
    grid = (n // bn,)
    in_specs = [pl.BlockSpec((bn, h, w * cin_pad), lambda i: (i, 0, 0))]
    in_specs += [_pinned_spec(a.shape) for a in weight_args]
    out_spec = pl.BlockSpec((bn, n_classes), lambda i: (i, 0))

    return pl.pallas_call(
        _cnn_fused_kernel,
        out_shape=jax.ShapeDtypeStruct((n, n_classes), jnp.float32),
        grid=grid,
        in_specs=in_specs,
        out_specs=out_spec,
        compiler_params=pltpu.CompilerParams(
            dimension_semantics=("parallel",)),
    )(x, *weight_args)


# ----------------------------- parameter setup ------------------------------

def _make_dy_toeplitz(w_conv, w_in_pad, w_out, w_out_pad):
    """torch conv weight (Cout, Cin, KH, KW) -> (KH*w_in_pad*Cin, w_out_pad*Cout)
    block-Toeplitz over the W axis, dy-major along the contraction axis (matches the
    kernel's lane concat of the KH H-shifted input slices).  Padded w positions get
    zero rows/columns."""
    cout, cin, kh, kw = w_conv.shape
    assert kh == KH and kw == KW
    t = np.zeros((kh, w_in_pad * cin, w_out_pad * cout), np.float32)
    wn = np.asarray(w_conv, np.float32)
    for dy in range(kh):
        for dx in range(kw):
            tap = wn[:, :, dy, dx].T                         # (Cin, Cout)
            for wo in range(w_out):
                wi = wo + dx
                t[dy, wi * cin:(wi + 1) * cin, wo * cout:(wo + 1) * cout] = tap
    return t.reshape(kh * w_in_pad * cin, w_out_pad * cout)


def init_raw_params(key, n_channels, n_classes, in_hw):
    """Deterministic synthetic parameters in the original torch layouts."""
    raw = {"convs": [], "in_hw": in_hw, "n_classes": n_classes}
    chans = [n_channels, 8, 16, 32]
    h, w = in_hw
    k = key
    for li in range(3):
        cin, cout = chans[li], chans[li + 1]
        k, k1, k2, k3, k4, k5, k6 = jax.random.split(k, 7)
        conv_w = jax.random.normal(k1, (cout, cin, KH, KW), jnp.float32) * 0.1
        conv_b = jax.random.normal(k2, (cout,), jnp.float32) * 0.1
        gamma = 1.0 + 0.1 * jax.random.normal(k3, (cout,), jnp.float32)
        beta = 0.1 * jax.random.normal(k4, (cout,), jnp.float32)
        run_mean = 0.1 * jax.random.normal(k5, (cout,), jnp.float32)
        run_var = 1.0 + 0.1 * jax.random.uniform(k6, (cout,), jnp.float32)
        raw["convs"].append(dict(w=conv_w, b=conv_b, gamma=gamma, beta=beta,
                                 mean=run_mean, var=run_var))
        h, w = h - (KH - 1), w - (KW - 1)

    c_last = chans[-1]
    flat_dim = c_last * h * w
    k, k1, k2, k3, k4 = jax.random.split(k, 5)
    raw["fc1_w"] = jax.random.normal(k1, (flat_dim, 128), jnp.float32) * 0.05
    raw["fc1_b"] = jax.random.normal(k2, (128,), jnp.float32) * 0.05
    raw["fc2_w"] = jax.random.normal(k3, (128, n_classes), jnp.float32) * 0.05
    raw["fc2_b"] = jax.random.normal(k4, (n_classes,), jnp.float32) * 0.05
    raw["out_hw"] = (h, w)
    raw["c_last"] = c_last
    return raw


def pack_params(raw):
    """Fold eval-mode BN into per-column scale/shift, build lane-padded block-Toeplitz
    conv weights and the NHWC-permuted (H3, W3_pad*C, 128) fc1 weight; bf16 operands."""
    params = {}
    h, w = raw["in_hw"]
    w_pad = w
    for li, cv in enumerate(raw["convs"]):
        w_conv = np.asarray(cv["w"], np.float32)
        cout, cin = w_conv.shape[0], w_conv.shape[1]
        if li == 0 and cin < CIN_PAD:
            w_conv = np.concatenate(
                [w_conv, np.zeros((cout, CIN_PAD - cin, KH, KW), np.float32)], axis=1)
            cin = CIN_PAD
        assert (w_pad * cin) % 128 == 0, "input slab must be lane-aligned"

        inv_std = 1.0 / np.sqrt(np.asarray(cv["var"], np.float32) + BN_EPS)
        scale = np.asarray(cv["gamma"], np.float32) * inv_std
        shift = (np.asarray(cv["beta"], np.float32)
                 + (np.asarray(cv["b"], np.float32)
                    - np.asarray(cv["mean"], np.float32)) * scale)

        h_out, w_out = h - (KH - 1), w - (KH - 1)
        m_pad = -(-(w_out * cout) // 128) * 128           # round up to lane multiple
        assert m_pad % cout == 0
        w_out_pad = m_pad // cout

        params[f"conv{li}_w"] = jnp.asarray(
            _make_dy_toeplitz(w_conv, w_pad, w_out, w_out_pad), jnp.bfloat16)
        sc = np.zeros((w_out_pad, cout), np.float32); sc[:w_out] = scale
        sh = np.zeros((w_out_pad, cout), np.float32); sh[:w_out] = shift
        params[f"conv{li}_scale"] = jnp.asarray(sc.reshape(1, w_out_pad * cout))
        params[f"conv{li}_shift"] = jnp.asarray(sh.reshape(1, w_out_pad * cout))

        h, w, w_pad = h_out, w_out, w_out_pad

    c_last = raw["c_last"]
    h3, w3 = raw["out_hw"]
    hidden = raw["fc1_w"].shape[1]
    w3_pad = w_pad
    # fc1 rows are generated in torch NCHW-flatten order (c,h,w); permute to (h,w,c)
    # and keep the H axis separate so the kernel's fc1 is H3 accumulated dots.
    fc1 = np.asarray(raw["fc1_w"], np.float32).reshape(c_last, h3, w3, hidden)
    fc1 = fc1.transpose(1, 2, 0, 3)                        # (h3, w3, c, hidden)
    if w3_pad > w3:
        fc1 = np.concatenate(
            [fc1, np.zeros((h3, w3_pad - w3, c_last, hidden), np.float32)], axis=1)
    params["fc1_w"] = jnp.asarray(fc1.reshape(h3, w3_pad * c_last, hidden), jnp.bfloat16)
    params["fc1_b"] = jnp.asarray(np.asarray(raw["fc1_b"], np.float32).reshape(1, hidden))
    params["fc2_w"] = jnp.asarray(np.asarray(raw["fc2_w"], np.float32), jnp.bfloat16)
    params["fc2_b"] = jnp.asarray(
        np.asarray(raw["fc2_b"], np.float32).reshape(1, raw["n_classes"]))
    return params


# ----------------------------- pure-JAX f32 reference ------------------------------

def reference_forward(raw, x_nchw):
    x = x_nchw.astype(jnp.float32)
    for cv in raw["convs"]:
        y = lax.conv_general_dilated(
            x, cv["w"], window_strides=(1, 1), padding="VALID",
            dimension_numbers=("NCHW", "OIHW", "NCHW"))
        y = y + cv["b"][None, :, None, None]
        inv_std = 1.0 / jnp.sqrt(cv["var"] + BN_EPS)
        y = ((y - cv["mean"][None, :, None, None])
             * (cv["gamma"] * inv_std)[None, :, None, None]
             + cv["beta"][None, :, None, None])
        x = jnp.where(y >= 0, y, LEAKY_SLOPE * y)
    flat = x.reshape(x.shape[0], -1)                       # torch NCHW flatten
    h = flat @ raw["fc1_w"] + raw["fc1_b"]
    h = jnp.where(h >= 0, h, LEAKY_SLOPE * h)
    return h @ raw["fc2_w"] + raw["fc2_b"]


# ---------------------------------- main -------------------------------------

if __name__ == "__main__":
    key = jax.random.PRNGKey(0)
    k_x, k_p = jax.random.split(key)

    N, C, H, W = 2, 4, 16, 16
    n_classes = 10

    x = jax.random.normal(k_x, (N, C, H, W), jnp.float32)
    raw = init_raw_params(k_p, n_channels=C, n_classes=n_classes, in_hw=(H, W))
    params = pack_params(raw)

    fwd = jax.jit(cnn_forward)
    out = jax.block_until_ready(fwd(params, x))
    assert out.shape == (N, n_classes), out.shape

    ref = reference_forward(raw, x)
    err = float(jnp.max(jnp.abs(out - ref)))
    # bf16 MXU operands -> expect ~1e-2 absolute deviation vs the f32 reference.
    assert err < 0.1, f"max abs error vs f32 reference: {err}"
    print("KERNEL_OK")
</pallas_src>

<mosaic_0001>
module attributes {stable_mosaic.version = 11 : i64} {
  func.func @_cnn_fused_kernel(%arg0: i32, %arg1: memref<2x16x128xbf16, #tpu.memory_space<vmem>>, %arg2: memref<640x128xbf16, #tpu.memory_space<vmem>>, %arg3: memref<1x128xf32, #tpu.memory_space<vmem>>, %arg4: memref<1x128xf32, #tpu.memory_space<vmem>>, %arg5: memref<640x128xbf16, #tpu.memory_space<vmem>>, %arg6: memref<1x128xf32, #tpu.memory_space<vmem>>, %arg7: memref<1x128xf32, #tpu.memory_space<vmem>>, %arg8: memref<640x128xbf16, #tpu.memory_space<vmem>>, %arg9: memref<1x128xf32, #tpu.memory_space<vmem>>, %arg10: memref<1x128xf32, #tpu.memory_space<vmem>>, %arg11: memref<4x128x128xbf16, #tpu.memory_space<vmem>>, %arg12: memref<1x128xf32, #tpu.memory_space<vmem>>, %arg13: memref<128x10xbf16, #tpu.memory_space<vmem>>, %arg14: memref<1x10xf32, #tpu.memory_space<vmem>>, %arg15: memref<2x10xf32, #tpu.memory_space<vmem>>) attributes {dimension_semantics = [#tpu.dimension_semantics<parallel>], iteration_bounds = array<i64: 1>, scalar_prefetch = 0 : i64, scratch_operands = 0 : i64, tpu.core_type = #tpu.core_type<tc>, window_params = [{transform_indices = @transform_0, window_bounds = array<i64: 2, 16, 128>}, {pipeline_mode = #tpu.pipeline_mode<synchronous>, transform_indices = @transform_1, window_bounds = array<i64: 640, 128>}, {pipeline_mode = #tpu.pipeline_mode<synchronous>, transform_indices = @transform_2, window_bounds = array<i64: 1, 128>}, {pipeline_mode = #tpu.pipeline_mode<synchronous>, transform_indices = @transform_3, window_bounds = array<i64: 1, 128>}, {pipeline_mode = #tpu.pipeline_mode<synchronous>, transform_indices = @transform_4, window_bounds = array<i64: 640, 128>}, {pipeline_mode = #tpu.pipeline_mode<synchronous>, transform_indices = @transform_5, window_bounds = array<i64: 1, 128>}, {pipeline_mode = #tpu.pipeline_mode<synchronous>, transform_indices = @transform_6, window_bounds = array<i64: 1, 128>}, {pipeline_mode = #tpu.pipeline_mode<synchronous>, transform_indices = @transform_7, window_bounds = array<i64: 640, 128>}, {pipeline_mode = #tpu.pipeline_mode<synchronous>, transform_indices = @transform_8, window_bounds = array<i64: 1, 128>}, {pipeline_mode = #tpu.pipeline_mode<synchronous>, transform_indices = @transform_9, window_bounds = array<i64: 1, 128>}, {pipeline_mode = #tpu.pipeline_mode<synchronous>, transform_indices = @transform_10, window_bounds = array<i64: 4, 128, 128>}, {pipeline_mode = #tpu.pipeline_mode<synchronous>, transform_indices = @transform_11, window_bounds = array<i64: 1, 128>}, {pipeline_mode = #tpu.pipeline_mode<synchronous>, transform_indices = @transform_12, window_bounds = array<i64: 128, 10>}, {pipeline_mode = #tpu.pipeline_mode<synchronous>, transform_indices = @transform_13, window_bounds = array<i64: 1, 10>}, {transform_indices = @transform_14, window_bounds = array<i64: 2, 10>}]} {
    %c0 = arith.constant 0 : index
    %c0_0 = arith.constant 0 : index
    %c0_1 = arith.constant 0 : index
    %0 = vector.load %arg1[%c0, %c0_0, %c0_1] : memref<2x16x128xbf16, #tpu.memory_space<vmem>>, vector<2x16x128xbf16>
    %1 = vector.extract_strided_slice %0 {offsets = [0, 0, 0], sizes = [2, 12, 128], strides = [1, 1, 1]} : vector<2x16x128xbf16> to vector<2x12x128xbf16>
    %2 = vector.extract_strided_slice %0 {offsets = [0, 1, 0], sizes = [2, 12, 128], strides = [1, 1, 1]} : vector<2x16x128xbf16> to vector<2x12x128xbf16>
    %3 = vector.extract_strided_slice %0 {offsets = [0, 2, 0], sizes = [2, 12, 128], strides = [1, 1, 1]} : vector<2x16x128xbf16> to vector<2x12x128xbf16>
    %4 = vector.extract_strided_slice %0 {offsets = [0, 3, 0], sizes = [2, 12, 128], strides = [1, 1, 1]} : vector<2x16x128xbf16> to vector<2x12x128xbf16>
    %5 = vector.extract_strided_slice %0 {offsets = [0, 4, 0], sizes = [2, 12, 128], strides = [1, 1, 1]} : vector<2x16x128xbf16> to vector<2x12x128xbf16>
    %6 = tpu.concatenate %1, %2, %3, %4, %5 in 2 : vector<2x12x128xbf16>, vector<2x12x128xbf16>, vector<2x12x128xbf16>, vector<2x12x128xbf16>, vector<2x12x128xbf16> -> vector<2x12x640xbf16>
    %7 = vector.shape_cast %6 : vector<2x12x640xbf16> to vector<24x640xbf16>
    %c0_2 = arith.constant 0 : index
    %c0_3 = arith.constant 0 : index
    %8 = vector.load %arg2[%c0_2, %c0_3] : memref<640x128xbf16, #tpu.memory_space<vmem>>, vector<640x128xbf16>
    %cst = arith.constant dense<0.000000e+00> : vector<24x128xf32>
    %9 = tpu.matmul %7, %8, %cst {dimension_numbers = #tpu.dot_dimension_numbers<[1], [0], [0], [1], [0, 0, 1, 1], [], []>} : vector<24x640xbf16>, vector<640x128xbf16>, vector<24x128xf32> -> vector<24x128xf32>
    %c0_4 = arith.constant 0 : index
    %c0_5 = arith.constant 0 : index
    %10 = vector.load %arg3[%c0_4, %c0_5] : memref<1x128xf32, #tpu.memory_space<vmem>>, vector<1x128xf32>
    %11 = vector.broadcast %10 : vector<1x128xf32> to vector<24x128xf32>
    %12 = arith.mulf %9, %11 : vector<24x128xf32>
    %c0_6 = arith.constant 0 : index
    %c0_7 = arith.constant 0 : index
    %13 = vector.load %arg4[%c0_6, %c0_7] : memref<1x128xf32, #tpu.memory_space<vmem>>, vector<1x128xf32>
    %14 = vector.broadcast %13 : vector<1x128xf32> to vector<24x128xf32>
    %15 = arith.addf %12, %14 : vector<24x128xf32>
    %cst_8 = arith.constant 0.000000e+00 : f32
    %16 = vector.broadcast %cst_8 : f32 to vector<24x128xf32>
    %17 = arith.cmpf oge, %15, %16 : vector<24x128xf32>
    %cst_9 = arith.constant 0.00999999977 : f32
    %18 = vector.broadcast %cst_9 : f32 to vector<24x128xf32>
    %19 = arith.mulf %18, %15 : vector<24x128xf32>
    %20 = arith.select %17, %15, %19 : vector<24x128xi1>, vector<24x128xf32>
    %21 = arith.truncf %20 : vector<24x128xf32> to vector<24x128xbf16>
    %22 = vector.shape_cast %21 : vector<24x128xbf16> to vector<2x12x128xbf16>
    %23 = vector.extract_strided_slice %22 {offsets = [0, 0, 0], sizes = [2, 8, 128], strides = [1, 1, 1]} : vector<2x12x128xbf16> to vector<2x8x128xbf16>
    %24 = vector.extract_strided_slice %22 {offsets = [0, 1, 0], sizes = [2, 8, 128], strides = [1, 1, 1]} : vector<2x12x128xbf16> to vector<2x8x128xbf16>
    %25 = vector.extract_strided_slice %22 {offsets = [0, 2, 0], sizes = [2, 8, 128], strides = [1, 1, 1]} : vector<2x12x128xbf16> to vector<2x8x128xbf16>
    %26 = vector.extract_strided_slice %22 {offsets = [0, 3, 0], sizes = [2, 8, 128], strides = [1, 1, 1]} : vector<2x12x128xbf16> to vector<2x8x128xbf16>
    %27 = vector.extract_strided_slice %22 {offsets = [0, 4, 0], sizes = [2, 8, 128], strides = [1, 1, 1]} : vector<2x12x128xbf16> to vector<2x8x128xbf16>
    %28 = tpu.concatenate %23, %24, %25, %26, %27 in 2 : vector<2x8x128xbf16>, vector<2x8x128xbf16>, vector<2x8x128xbf16>, vector<2x8x128xbf16>, vector<2x8x128xbf16> -> vector<2x8x640xbf16>
    %29 = vector.shape_cast %28 : vector<2x8x640xbf16> to vector<16x640xbf16>
    %c0_10 = arith.constant 0 : index
    %c0_11 = arith.constant 0 : index
    %30 = vector.load %arg5[%c0_10, %c0_11] : memref<640x128xbf16, #tpu.memory_space<vmem>>, vector<640x128xbf16>
    %cst_12 = arith.constant dense<0.000000e+00> : vector<16x128xf32>
    %31 = tpu.matmul %29, %30, %cst_12 {dimension_numbers = #tpu.dot_dimension_numbers<[1], [0], [0], [1], [0, 0, 1, 1], [], []>} : vector<16x640xbf16>, vector<640x128xbf16>, vector<16x128xf32> -> vector<16x128xf32>
    %c0_13 = arith.constant 0 : index
    %c0_14 = arith.constant 0 : index
    %32 = vector.load %arg6[%c0_13, %c0_14] : memref<1x128xf32, #tpu.memory_space<vmem>>, vector<1x128xf32>
    %33 = vector.broadcast %32 : vector<1x128xf32> to vector<16x128xf32>
    %34 = arith.mulf %31, %33 : vector<16x128xf32>
    %c0_15 = arith.constant 0 : index
    %c0_16 = arith.constant 0 : index
    %35 = vector.load %arg7[%c0_15, %c0_16] : memref<1x128xf32, #tpu.memory_space<vmem>>, vector<1x128xf32>
    %36 = vector.broadcast %35 : vector<1x128xf32> to vector<16x128xf32>
    %37 = arith.addf %34, %36 : vector<16x128xf32>
    %cst_17 = arith.constant 0.000000e+00 : f32
    %38 = vector.broadcast %cst_17 : f32 to vector<16x128xf32>
    %39 = arith.cmpf oge, %37, %38 : vector<16x128xf32>
    %cst_18 = arith.constant 0.00999999977 : f32
    %40 = vector.broadcast %cst_18 : f32 to vector<16x128xf32>
    %41 = arith.mulf %40, %37 : vector<16x128xf32>
    %42 = arith.select %39, %37, %41 : vector<16x128xi1>, vector<16x128xf32>
    %43 = arith.truncf %42 : vector<16x128xf32> to vector<16x128xbf16>
    %44 = vector.shape_cast %43 : vector<16x128xbf16> to vector<2x8x128xbf16>
    %45 = vector.extract_strided_slice %44 {offsets = [0, 0, 0], sizes = [2, 4, 128], strides = [1, 1, 1]} : vector<2x8x128xbf16> to vector<2x4x128xbf16>
    %46 = vector.extract_strided_slice %44 {offsets = [0, 1, 0], sizes = [2, 4, 128], strides = [1, 1, 1]} : vector<2x8x128xbf16> to vector<2x4x128xbf16>
    %47 = vector.extract_strided_slice %44 {offsets = [0, 2, 0], sizes = [2, 4, 128], strides = [1, 1, 1]} : vector<2x8x128xbf16> to vector<2x4x128xbf16>
    %48 = vector.extract_strided_slice %44 {offsets = [0, 3, 0], sizes = [2, 4, 128], strides = [1, 1, 1]} : vector<2x8x128xbf16> to vector<2x4x128xbf16>
    %49 = vector.extract_strided_slice %44 {offsets = [0, 4, 0], sizes = [2, 4, 128], strides = [1, 1, 1]} : vector<2x8x128xbf16> to vector<2x4x128xbf16>
    %50 = tpu.concatenate %45, %46, %47, %48, %49 in 2 : vector<2x4x128xbf16>, vector<2x4x128xbf16>, vector<2x4x128xbf16>, vector<2x4x128xbf16>, vector<2x4x128xbf16> -> vector<2x4x640xbf16>
    %51 = vector.shape_cast %50 : vector<2x4x640xbf16> to vector<8x640xbf16>
    %c0_19 = arith.constant 0 : index
    %c0_20 = arith.constant 0 : index
    %52 = vector.load %arg8[%c0_19, %c0_20] : memref<640x128xbf16, #tpu.memory_space<vmem>>, vector<640x128xbf16>
    %cst_21 = arith.constant dense<0.000000e+00> : vector<8x128xf32>
    %53 = tpu.matmul %51, %52, %cst_21 {dimension_numbers = #tpu.dot_dimension_numbers<[1], [0], [0], [1], [0, 0, 1, 1], [], []>} : vector<8x640xbf16>, vector<640x128xbf16>, vector<8x128xf32> -> vector<8x128xf32>
    %c0_22 = arith.constant 0 : index
    %c0_23 = arith.constant 0 : index
    %54 = vector.load %arg9[%c0_22, %c0_23] : memref<1x128xf32, #tpu.memory_space<vmem>>, vector<1x128xf32>
    %55 = vector.broadcast %54 : vector<1x128xf32> to vector<8x128xf32>
    %56 = arith.mulf %53, %55 : vector<8x128xf32>
    %c0_24 = arith.constant 0 : index
    %c0_25 = arith.constant 0 : index
    %57 = vector.load %arg10[%c0_24, %c0_25] : memref<1x128xf32, #tpu.memory_space<vmem>>, vector<1x128xf32>
    %58 = vector.broadcast %57 : vector<1x128xf32> to vector<8x128xf32>
    %59 = arith.addf %56, %58 : vector<8x128xf32>
    %cst_26 = arith.constant 0.000000e+00 : f32
    %60 = vector.broadcast %cst_26 : f32 to vector<8x128xf32>
    %61 = arith.cmpf oge, %59, %60 : vector<8x128xf32>
    %cst_27 = arith.constant 0.00999999977 : f32
    %62 = vector.broadcast %cst_27 : f32 to vector<8x128xf32>
    %63 = arith.mulf %62, %59 : vector<8x128xf32>
    %64 = arith.select %61, %59, %63 : vector<8x128xi1>, vector<8x128xf32>
    %65 = arith.truncf %64 : vector<8x128xf32> to vector<8x128xbf16>
    %66 = vector.shape_cast %65 : vector<8x128xbf16> to vector<2x4x128xbf16>
    %67 = vector.extract_strided_slice %66 {offsets = [0, 0, 0], sizes = [2, 1, 128], strides = [1, 1, 1]} : vector<2x4x128xbf16> to vector<2x1x128xbf16>
    %68 = vector.shape_cast %67 : vector<2x1x128xbf16> to vector<2x128xbf16>
    %c0_28 = arith.constant 0 : index
    %c0_29 = arith.constant 0 : index
    %c0_30 = arith.constant 0 : index
    %69 = vector.load %arg11[%c0_28, %c0_29, %c0_30] : memref<4x128x128xbf16, #tpu.memory_space<vmem>>, vector<1x128x128xbf16>
    %70 = vector.shape_cast %69 : vector<1x128x128xbf16> to vector<128x128xbf16>
    %cst_31 = arith.constant dense<0.000000e+00> : vector<2x128xf32>
    %71 = tpu.matmul %68, %70, %cst_31 {dimension_numbers = #tpu.dot_dimension_numbers<[1], [0], [0], [1], [0, 0, 1, 1], [], []>} : vector<2x128xbf16>, vector<128x128xbf16>, vector<2x128xf32> -> vector<2x128xf32>
    %72 = vector.extract_strided_slice %66 {offsets = [0, 1, 0], sizes = [2, 1, 128], strides = [1, 1, 1]} : vector<2x4x128xbf16> to vector<2x1x128xbf16>
    %73 = vector.shape_cast %72 : vector<2x1x128xbf16> to vector<2x128xbf16>
    %c1 = arith.constant 1 : index
    %c0_32 = arith.constant 0 : index
    %c0_33 = arith.constant 0 : index
    %74 = vector.load %arg11[%c1, %c0_32, %c0_33] : memref<4x128x128xbf16, #tpu.memory_space<vmem>>, vector<1x128x128xbf16>
    %75 = vector.shape_cast %74 : vector<1x128x128xbf16> to vector<128x128xbf16>
    %cst_34 = arith.constant dense<0.000000e+00> : vector<2x128xf32>
    %76 = tpu.matmul %73, %75, %cst_34 {dimension_numbers = #tpu.dot_dimension_numbers<[1], [0], [0], [1], [0, 0, 1, 1], [], []>} : vector<2x128xbf16>, vector<128x128xbf16>, vector<2x128xf32> -> vector<2x128xf32>
    %77 = arith.addf %71, %76 : vector<2x128xf32>
    %78 = vector.extract_strided_slice %66 {offsets = [0, 2, 0], sizes = [2, 1, 128], strides = [1, 1, 1]} : vector<2x4x128xbf16> to vector<2x1x128xbf16>
    %79 = vector.shape_cast %78 : vector<2x1x128xbf16> to vector<2x128xbf16>
    %c2 = arith.constant 2 : index
    %c0_35 = arith.constant 0 : index
    %c0_36 = arith.constant 0 : index
    %80 = vector.load %arg11[%c2, %c0_35, %c0_36] : memref<4x128x128xbf16, #tpu.memory_space<vmem>>, vector<1x128x128xbf16>
    %81 = vector.shape_cast %80 : vector<1x128x128xbf16> to vector<128x128xbf16>
    %cst_37 = arith.constant dense<0.000000e+00> : vector<2x128xf32>
    %82 = tpu.matmul %79, %81, %cst_37 {dimension_numbers = #tpu.dot_dimension_numbers<[1], [0], [0], [1], [0, 0, 1, 1], [], []>} : vector<2x128xbf16>, vector<128x128xbf16>, vector<2x128xf32> -> vector<2x128xf32>
    %83 = arith.addf %77, %82 : vector<2x128xf32>
    %84 = vector.extract_strided_slice %66 {offsets = [0, 3, 0], sizes = [2, 1, 128], strides = [1, 1, 1]} : vector<2x4x128xbf16> to vector<2x1x128xbf16>
    %85 = vector.shape_cast %84 : vector<2x1x128xbf16> to vector<2x128xbf16>
    %c3 = arith.constant 3 : index
    %c0_38 = arith.constant 0 : index
    %c0_39 = arith.constant 0 : index
    %86 = vector.load %arg11[%c3, %c0_38, %c0_39] : memref<4x128x128xbf16, #tpu.memory_space<vmem>>, vector<1x128x128xbf16>
    %87 = vector.shape_cast %86 : vector<1x128x128xbf16> to vector<128x128xbf16>
    %cst_40 = arith.constant dense<0.000000e+00> : vector<2x128xf32>
    %88 = tpu.matmul %85, %87, %cst_40 {dimension_numbers = #tpu.dot_dimension_numbers<[1], [0], [0], [1], [0, 0, 1, 1], [], []>} : vector<2x128xbf16>, vector<128x128xbf16>, vector<2x128xf32> -> vector<2x128xf32>
    %89 = arith.addf %83, %88 : vector<2x128xf32>
    %c0_41 = arith.constant 0 : index
    %c0_42 = arith.constant 0 : index
    %90 = vector.load %arg12[%c0_41, %c0_42] : memref<1x128xf32, #tpu.memory_space<vmem>>, vector<1x128xf32>
    %91 = vector.broadcast %90 : vector<1x128xf32> to vector<2x128xf32>
    %92 = arith.addf %89, %91 : vector<2x128xf32>
    %cst_43 = arith.constant 0.000000e+00 : f32
    %93 = vector.broadcast %cst_43 : f32 to vector<2x128xf32>
    %94 = arith.cmpf oge, %92, %93 : vector<2x128xf32>
    %cst_44 = arith.constant 0.00999999977 : f32
    %95 = vector.broadcast %cst_44 : f32 to vector<2x128xf32>
    %96 = arith.mulf %95, %92 : vector<2x128xf32>
    %97 = arith.select %94, %92, %96 : vector<2x128xi1>, vector<2x128xf32>
    %98 = arith.truncf %97 : vector<2x128xf32> to vector<2x128xbf16>
    %c0_45 = arith.constant 0 : index
    %c0_46 = arith.constant 0 : index
    %99 = vector.load %arg13[%c0_45, %c0_46] : memref<128x10xbf16, #tpu.memory_space<vmem>>, vector<128x10xbf16>
    %cst_47 = arith.constant dense<0.000000e+00> : vector<2x10xf32>
    %100 = tpu.matmul %98, %99, %cst_47 {dimension_numbers = #tpu.dot_dimension_numbers<[1], [0], [0], [1], [0, 0, 1, 1], [], []>} : vector<2x128xbf16>, vector<128x10xbf16>, vector<2x10xf32> -> vector<2x10xf32>
    %c0_48 = arith.constant 0 : index
    %c0_49 = arith.constant 0 : index
    %101 = vector.load %arg14[%c0_48, %c0_49] : memref<1x10xf32, #tpu.memory_space<vmem>>, vector<1x10xf32>
    %102 = vector.broadcast %101 : vector<1x10xf32> to vector<2x10xf32>
    %103 = arith.addf %100, %102 : vector<2x10xf32>
    %c0_50 = arith.constant 0 : index
    %c0_51 = arith.constant 0 : index
    %104 = vector.load %arg15[%c0_50, %c0_51] : memref<2x10xf32, #tpu.memory_space<vmem>>, vector<2x10xf32>
    tpu.vector_store %arg15[%c0_50, %c0_51], %103 {strides = array<i32>} : memref<2x10xf32, #tpu.memory_space<vmem>>, vector<2x10xf32>,
    return
  }
  func.func @transform_0(%arg0: i32) -> (i32, i32, i32) {
    %c0_i32 = arith.constant 0 : i32
    %c0_i32_0 = arith.constant 0 : i32
    %c0_i32_1 = arith.constant 0 : i32
    return %arg0, %c0_i32, %c0_i32_0 : i32, i32, i32
  }
  func.func @transform_1(%arg0: i32) -> (i32, i32) {
    %c0_i32 = arith.constant 0 : i32
    %c0_i32_0 = arith.constant 0 : i32
    %c0_i32_1 = arith.constant 0 : i32
    return %c0_i32, %c0_i32_0 : i32, i32
  }
  func.func @transform_2(%arg0: i32) -> (i32, i32) {
    %c0_i32 = arith.constant 0 : i32
    %c0_i32_0 = arith.constant 0 : i32
    %c0_i32_1 = arith.constant 0 : i32
    return %c0_i32, %c0_i32_0 : i32, i32
  }
  func.func @transform_3(%arg0: i32) -> (i32, i32) {
    %c0_i32 = arith.constant 0 : i32
    %c0_i32_0 = arith.constant 0 : i32
    %c0_i32_1 = arith.constant 0 : i32
    return %c0_i32, %c0_i32_0 : i32, i32
  }
  func.func @transform_4(%arg0: i32) -> (i32, i32) {
    %c0_i32 = arith.constant 0 : i32
    %c0_i32_0 = arith.constant 0 : i32
    %c0_i32_1 = arith.constant 0 : i32
    return %c0_i32, %c0_i32_0 : i32, i32
  }
  func.func @transform_5(%arg0: i32) -> (i32, i32) {
    %c0_i32 = arith.constant 0 : i32
    %c0_i32_0 = arith.constant 0 : i32
    %c0_i32_1 = arith.constant 0 : i32
    return %c0_i32, %c0_i32_0 : i32, i32
  }
  func.func @transform_6(%arg0: i32) -> (i32, i32) {
    %c0_i32 = arith.constant 0 : i32
    %c0_i32_0 = arith.constant 0 : i32
    %c0_i32_1 = arith.constant 0 : i32
    return %c0_i32, %c0_i32_0 : i32, i32
  }
  func.func @transform_7(%arg0: i32) -> (i32, i32) {
    %c0_i32 = arith.constant 0 : i32
    %c0_i32_0 = arith.constant 0 : i32
    %c0_i32_1 = arith.constant 0 : i32
    return %c0_i32, %c0_i32_0 : i32, i32
  }
  func.func @transform_8(%arg0: i32) -> (i32, i32) {
    %c0_i32 = arith.constant 0 : i32
    %c0_i32_0 = arith.constant 0 : i32
    %c0_i32_1 = arith.constant 0 : i32
    return %c0_i32, %c0_i32_0 : i32, i32
  }
  func.func @transform_9(%arg0: i32) -> (i32, i32) {
    %c0_i32 = arith.constant 0 : i32
    %c0_i32_0 = arith.constant 0 : i32
    %c0_i32_1 = arith.constant 0 : i32
    return %c0_i32, %c0_i32_0 : i32, i32
  }
  func.func @transform_10(%arg0: i32) -> (i32, i32, i32) {
    %c0_i32 = arith.constant 0 : i32
    %c0_i32_0 = arith.constant 0 : i32
    %c0_i32_1 = arith.constant 0 : i32
    %c0_i32_2 = arith.constant 0 : i32
    return %c0_i32, %c0_i32_0, %c0_i32_1 : i32, i32, i32
  }
  func.func @transform_11(%arg0: i32) -> (i32, i32) {
    %c0_i32 = arith.constant 0 : i32
    %c0_i32_0 = arith.constant 0 : i32
    %c0_i32_1 = arith.constant 0 : i32
    return %c0_i32, %c0_i32_0 : i32, i32
  }
  func.func @transform_12(%arg0: i32) -> (i32, i32) {
    %c0_i32 = arith.constant 0 : i32
    %c0_i32_0 = arith.constant 0 : i32
    %c0_i32_1 = arith.constant 0 : i32
    return %c0_i32, %c0_i32_0 : i32, i32
  }
  func.func @transform_13(%arg0: i32) -> (i32, i32) {
    %c0_i32 = arith.constant 0 : i32
    %c0_i32_0 = arith.constant 0 : i32
    %c0_i32_1 = arith.constant 0 : i32
    return %c0_i32, %c0_i32_0 : i32, i32
  }
  func.func @transform_14(%arg0: i32) -> (i32, i32) {
    %c0_i32 = arith.constant 0 : i32
    %c0_i32_0 = arith.constant 0 : i32
    return %arg0, %c0_i32 : i32, i32
  }
}

</mosaic_0001>

<bundles_post_ra>
// kernel: cnn_forward.1
= control target key start
LH: loop header
LB: loop body
LE: loop exit
PB: predicated region body
PF: predicated region fallthrough
CT: control target
= control target key end

     0   :  { %19 = vsyncpa [#allocation3], 0  ;;  %s3531_s0 = inlined_call_operand.vmem [shape: bf16[2,16,128], index: 0, kind: input, shape index: {}]   ;;  %s3532_s1 = inlined_call_operand.vmem [shape: bf16[640,128], index: 1, kind: input, shape index: {}]   ;;  %s3533_s2 = inlined_call_operand.vmem [shape: f32[1,128], index: 2, kind: input, shape index: {}]   ;;  %s3534_s3 = inlined_call_operand.vmem [shape: f32[1,128], index: 3, kind: input, shape index: {}]   ;;  %s3535_s4 = inlined_call_operand.vmem [shape: bf16[640,128], index: 4, kind: input, shape index: {}]   ;;  %s3536_s5 = inlined_call_operand.vmem [shape: f32[1,128], index: 5, kind: input, shape index: {}]   ;;  %s3537_s6 = inlined_call_operand.vmem [shape: f32[1,128], index: 6, kind: input, shape index: {}]   ;;  %s3538_s7 = inlined_call_operand.hbm [shape: bf16[640,128], index: 7, kind: input, shape index: {}]   ;;  %s3539_s8 = inlined_call_operand.vmem [shape: f32[1,128], index: 8, kind: input, shape index: {}]   ;;  %s3540_s9 = inlined_call_operand.vmem [shape: f32[1,128], index: 9, kind: input, shape index: {}]   ;;  %s3541_s10 = inlined_call_operand.hbm [shape: bf16[4,128,128], index: 10, kind: input, shape index: {}]   ;;  %s3542_s11 = inlined_call_operand.vmem [shape: f32[1,128], index: 11, kind: input, shape index: {}]   ;;  %s3543_s12 = inlined_call_operand.vmem [shape: bf16[128,10], index: 12, kind: input, shape index: {}]   ;;  %s3544_s13 = inlined_call_operand.vmem [shape: f32[1,10], index: 13, kind: input, shape index: {}]   ;;  %s3545_s14 = inlined_call_operand.hbm [shape: f32[2,10], index: 14, kind: output, shape index: {}]  }
   0x1   :  { %20 = vsyncpa [#allocation6], 0 }
   0x2   :  { %21 = vsyncpa [#allocation4], 0  ;;  %s40_s15 = sshll.u32 %s3538_s7, 4  ;;  %s3057_s16 = smov [#allocation2]   ;;  %s41_s15 = int_to_ptr.hbm [resolvable:$true] %s40_s15 }
   0x3   :  { %s42_s17 = sshll.u32 %s3057_s16, 4  ;;  %s57_s20 = sshll.u32 %s3541_s10, 4  ;;  %s43_s17 = int_to_ptr.vmem [resolvable:$true] %s42_s17  ;;  %s58_s20 = int_to_ptr.hbm [resolvable:$true] %s57_s20 }
   0x4   :  { %s3058_s21 = smov 64   ;;  %s3059_s22 = smov 4  }
   0x5   :  { %48 = dma.hbm_to_vmem [thread:$0]  %s41_s15, 5120, %s43_s17, [#allocation3], %s3058_s21, %s3058_s21, %s3059_s22  }
   0x6   :  { %s3060_s23 = smov [#allocation5]  }
   0x7   :  { %s59_s24 = sshll.u32 %s3060_s23, 4  ;;  %s60_s24 = int_to_ptr.vmem [resolvable:$true] %s59_s24 }
   0x8   :  { %65 = dma.hbm_to_vmem [thread:$0]  %s58_s20, 4096, %s60_s24, [#allocation6], %s3058_s21, %s3058_s21, %s3059_s22  }
   0x9   :  { %3051 = dma.done.wait [#allocation3], 5120  }
   0xa   :  { %3052 = vsyncadd [#allocation3], 4294962176 }
   0xb   :  { %3053 = dma.done.wait [#allocation6], 4096  }
   0xc   :  { %3054 = vsyncadd [#allocation6], 4294963200  ;;  %v2813_v0 = vld [vmem:[%s3532_s1 + $0x38] sm:$0xff]  ;;  %v2812_v4 = vld [vmem:[%s3532_s1 + $0x30] sm:$0xff]  ;;  %vm124_vm0 = vcmask 1041408   ;;  %vm127_vm1 = vcmask 1045508  }
   0xd   :  { %v2821_v1 = vld [vmem:[%s3532_s1 + $0x78] sm:$0xff]  ;;  %535 = vmatpush.bf16.msra.mxu0 %v2813_v0  ;;  %v2820_v5 = vld [vmem:[%s3532_s1 + $0x70] sm:$0xff]  ;;  %v2811_v8 = vld [vmem:[%s3532_s1 + $0x28] sm:$0xff]  ;;  %vm133_vm2 = vcmask 1043458   ;;  %vm135_vm3 = vcmask 1045504   ;;  %vm137_vm4 = vcmask 1045506  }
   0xe   :  { %v2829_v2 = vld [vmem:[%s3532_s1 + $0xb8] sm:$0xff]  ;;  %553 = vmatpush.bf16.msra.mxu1 %v2821_v1  ;;  %v2828_v6 = vld [vmem:[%s3532_s1 + $0xb0] sm:$0xff]  ;;  %v2819_v9 = vld [vmem:[%s3532_s1 + $0x68] sm:$0xff]  ;;  %vm131_vm5 = vcmask 1043456   ;;  %vm1719_vm12 = vcmask 1041409   ;;  %vm2134_vm14 = vcmask 74752  }
   0xf   :  { %v2837_v3 = vld [vmem:[%s3532_s1 + $0xf8] sm:$0xff]  ;;  %571 = vmatpush.bf16.msra.mxu2 %v2829_v2  ;;  %v2836_v7 = vld [vmem:[%s3532_s1 + $0xf0] sm:$0xff]  ;;  %v2827_v10 = vld [vmem:[%s3532_s1 + $0xa8] sm:$0xff] }
  0x10   :  { %589 = vmatpush.bf16.msra.mxu3 %v2837_v3  ;;  %v2835_v11 = vld [vmem:[%s3532_s1 + $0xe8] sm:$0xff]  ;;  %v2810_v12 = vld [vmem:[%s3532_s1 + $0x20] sm:$0xff]  ;;  %v2809_v18 = vld [vmem:[%s3532_s1 + $0x18] sm:$0xff] }
  0x11   :  { %536 = vmatpush.bf16.msra.mxu0 %v2812_v4  ;;  %v2818_v13 = vld [vmem:[%s3532_s1 + $0x60] sm:$0xff]  ;;  %v3199_v17 = vld [vmem:[%s3531_s0 + $0x8] sm:$0xff]  ;;  %v2817_v19 = vld [vmem:[%s3532_s1 + $0x58] sm:$0xff] }
  0x12   :  { %554 = vmatpush.bf16.msra.mxu1 %v2820_v5  ;;  %v3188_v14 = vld [vmem:[%s3531_s0] sm:$0xff]  ;;  %v2825_v23 = vld [vmem:[%s3532_s1 + $0x98] sm:$0xff]  ;;  %v102_v25 = vshrl.u32 %v3199_v17, 16  ;;  %v104_v26 = vshll.u32 %v3199_v17, 16  ;;  %v109_v28 = vrot.slane %v3199_v17, 1  ;;  %v2808_v39 = vld [vmem:[%s3532_s1 + $0x10] sm:$0xff] }
  0x13   :  { %572 = vmatpush.bf16.msra.mxu2 %v2828_v6  ;;  %v2826_v15 = vld [vmem:[%s3532_s1 + $0xa0] sm:$0xff]  ;;  %v95_v20 = vshrl.u32 %v3188_v14, 16  ;;  %v97_v21 = vshll.u32 %v3188_v14, 16  ;;  %v108_v22 = vrot.slane %v3188_v14, 1  ;;  %v2833_v24 = vld [vmem:[%s3532_s1 + $0xd8] sm:$0xff]  ;;  %v2816_v40 = vld [vmem:[%s3532_s1 + $0x50] sm:$0xff] }
  0x14   :  { %590 = vmatpush.bf16.msra.mxu3 %v2836_v7  ;;  %v2834_v16 = vld [vmem:[%s3532_s1 + $0xe0] sm:$0xff]  ;;  %v106_v31 = vrot.slane %v104_v26, 1  ;;  %v113_v32 = vrot.slane %v102_v25, 1  ;;  %v114_v33 = vrot.slane %v104_v26, 2  ;;  %v122_v43 = vrot.slane %v109_v28, 4  ;;  %v2824_v44 = vld [vmem:[%s3532_s1 + $0x90] sm:$0xff] }
  0x15   :  { %537 = vmatpush.bf16.msra.mxu0 %v2811_v8  ;;  %v99_v27 = vrot.slane %v97_v21, 1  ;;  %v110_v29 = vrot.slane %v95_v20, 1  ;;  %v111_v30 = vrot.slane %v97_v21, 2  ;;  %v119_v34 = vrot.slane %v108_v22, 4  ;;  %v2832_v45 = vld [vmem:[%s3532_s1 + $0xd0] sm:$0xff]  ;;  %v2807_v56 = vld [vmem:[%s3532_s1 + $0x8] sm:$0xff] }
  0x16   :  { %555 = vmatpush.bf16.msra.mxu1 %v2819_v9  ;;  %v107_v37 = vor.u32 %v106_v31, %v102_v25  ;;  %v115_v38 = vor.u32 %v114_v33, %v113_v32  ;;  %v2815_v57 = vld [vmem:[%s3532_s1 + $0x48] sm:$0xff]  ;;  %v116_v2 = vrot.slane %v3188_v14, 2  ;;  %v2806_v6 = vld [vmem:[%s3532_s1] sm:$0xff] }
  0x17   :  { %573 = vmatpush.bf16.msra.mxu2 %v2827_v10  ;;  %v100_v35 = vor.u32 %v99_v27, %v95_v20  ;;  %v112_v36 = vor.u32 %v111_v30, %v110_v29  ;;  %v2823_v62 = vld [vmem:[%s3532_s1 + $0x88] sm:$0xff]  ;;  %v2814_v7 = vld [vmem:[%s3532_s1 + $0x40] sm:$0xff]  ;;  %v117_v10 = vrot.slane %v3199_v17, 2  ;;  %v2841_v29 = vld [vmem:[%s3532_s1 + $0x118] sm:$0xff] }
  0x18   :  { %591 = vmatpush.bf16.msra.mxu3 %v2835_v11  ;;  %v121_v46 = vrot.slane %v107_v37, 6  ;;  %v123_v47 = vrot.slane %v115_v38, 2  ;;  %v2831_v63 = vld [vmem:[%s3532_s1 + $0xc8] sm:$0xff]  ;;  %v141_v5 = vrot.slane %v116_v2, 2  ;;  %v147_v11 = vrot.slane %v116_v2, 4  ;;  %v2842_v28 = vld [vmem:[%s3532_s1 + $0x120] sm:$0xff] }
  0x19   :  { %538 = vmatpush.bf16.msra.mxu0 %v2810_v12  ;;  %v118_v41 = vrot.slane %v100_v35, 6  ;;  %v120_v42 = vrot.slane %v112_v36, 2  ;;  %v2822_v12 = vld [vmem:[%s3532_s1 + $0x80] sm:$0xff]  ;;  %257 = vst [vmem:[#allocation1 + $0x20] ss:$4 sm:$0xff] %v116_v2  ;;  %v165_v25 = vrot.slane %v117_v10, 4 }
  0x1a   :  { %556 = vmatpush.bf16.msra.mxu1 %v2818_v13  ;;  %v149_v60 = vsel %vm124_vm0, %v3199_v17, %v121_v46  ;;  %v152_v61 = vsel %vm127_vm1, %v122_v43, %v123_v47  ;;  %v154_v3 = vsel %vm133_vm2, %v3199_v17, %v121_v46  ;;  %v155_v4 = vsel %vm135_vm3, %v123_v47, %v122_v43  ;;  %v2830_v13 = vld [vmem:[%s3532_s1 + $0xc0] sm:$0xff]  ;;  %v2843_v26 = vld [vmem:[%s3532_s1 + $0x128] sm:$0xff]  ;;  %v2840_v30 = vld [vmem:[%s3532_s1 + $0x110] sm:$0xff] }
  0x1b   :  { %574 = vmatpush.bf16.msra.mxu2 %v2826_v15  ;;  %v126_v48 = vsel %vm124_vm0, %v3188_v14, %v118_v41  ;;  %v130_v49 = vsel %vm127_vm1, %v119_v34, %v120_v42  ;;  %v134_v50 = vsel %vm133_vm2, %v3188_v14, %v118_v41  ;;  %v136_v51 = vsel %vm135_vm3, %v120_v42, %v119_v34  ;;  %v2839_v35 = vld [vmem:[%s3532_s1 + $0x108] sm:$0xff]  ;;  %v2838_v36 = vld [vmem:[%s3532_s1 + $0x100] sm:$0xff] }
  0x1c   :  { %592 = vmatpush.bf16.msra.mxu3 %v2834_v16  ;;  %v132_v52 = vsel %vm131_vm5, %v126_v48, %v130_v49  ;;  %v138_v53 = vsel %vm137_vm4, %v134_v50, %v136_v51  ;;  %v142_v54 = vsel %vm127_vm1, %v3188_v14, %v118_v41  ;;  %v143_v55 = vsel %vm124_vm0, %v119_v34, %v120_v42  ;;  %v2845_v14 = vld [vmem:[%s3532_s1 + $0x138] sm:$0xff]  ;;  %v2852_v49 = vld [vmem:[%s3535_s4 + $0x30] sm:$0xff]  ;;  %v2972_v2 = vld [vmem:[%s3534_s3] ss:$0 sm:$0xff] }
  0x1d   :  { %539 = vmatpush.bf16.msra.mxu0 %v2809_v18  ;;  %v140_v58 = vrot.slane %v138_v53, 2  ;;  %v144_v59 = vsel %vm131_vm5, %v143_v55, %v142_v54  ;;  %v153_v1 = vsel %vm131_vm5, %v149_v60, %v152_v61  ;;  %246 = vst [vmem:[#allocation1] ss:$4 sm:$0xff] %v132_v52  ;;  %v160_v8 = vsel %vm127_vm1, %v3199_v17, %v121_v46  ;;  %v2844_v18 = vld [vmem:[%s3532_s1 + $0x130] sm:$0xff]  ;;  %v2853_v46 = vld [vmem:[%s3535_s4 + $0x38] sm:$0xff]  ;;  %v2851_v55 = vld [vmem:[%s3535_s4 + $0x28] sm:$0xff] }
  0x1e   :  { %557 = vmatpush.bf16.msra.mxu1 %v2817_v19  ;;  %v146_v0 = vrot.slane %v144_v59, 4  ;;  %254 = vst [vmem:[#allocation1 + $0x3] ss:$4 sm:$0xff] %v153_v1  ;;  %v161_v9 = vsel %vm124_vm0, %v122_v43, %v123_v47  ;;  %v156_v15 = vsel %vm137_vm4, %v154_v3, %v155_v4  ;;  %v3320_v59 = vld [vmem:[%s3533_s2] ss:$0 sm:$0xff]  ;;  %v2849_v3 = vld [vmem:[%s3535_s4 + $0x18] sm:$0xff] }
  0x1f   :  { %575 = vmatpush.bf16.msra.mxu2 %v2825_v23  ;;  %249 = vst [vmem:[#allocation1 + $0x1] ss:$4 sm:$0xff] %v140_v58  ;;  %v162_v16 = vsel %vm131_vm5, %v161_v9, %v160_v8  ;;  %v158_v17 = vrot.slane %v156_v15, 2  ;;  %v2848_v9 = vld [vmem:[%s3535_s4 + $0x10] sm:$0xff] }
  0x20   :  { %593 = vmatpush.bf16.msra.mxu3 %v2833_v24  ;;  %252 = vst [vmem:[#allocation1 + $0x2] ss:$4 sm:$0xff] %v146_v0  ;;  %v164_v19 = vrot.slane %v162_v16, 4  ;;  %v159_v24 = vrot.slane %v117_v10, 2 }
  0x21   :  { %540 = vmatpush.bf16.msra.mxu0 %v2808_v39  ;;  %260 = vst [vmem:[#allocation1 + $0x21] ss:$4 sm:$0xff] %v141_v5 }
  0x22   :  { %558 = vmatpush.bf16.msra.mxu1 %v2816_v40  ;;  %263 = vst [vmem:[#allocation1 + $0x22] ss:$4 sm:$0xff] %v147_v11 }
  0x23   :  { %576 = vmatpush.bf16.msra.mxu2 %v2824_v44  ;;  %266 = vst [vmem:[#allocation1 + $0x23] ss:$4 sm:$0xff] %v117_v10 }
  0x24   :  { %594 = vmatpush.bf16.msra.mxu3 %v2832_v45 }
  0x25   :  { %541 = vmatpush.bf16.msra.mxu0 %v2807_v56 }
  0x26   :  { %559 = vmatpush.bf16.msra.mxu1 %v2815_v57  ;;  %v2850_v57 = vld [vmem:[%s3535_s4 + $0x20] sm:$0xff] }
  0x27   :  { %577 = vmatpush.bf16.msra.mxu2 %v2823_v62  ;;  %v267_v20 = vld.sshfl [vmem:[#allocation1] sm:$0xff pattern:$0x73625140]  ;;  %v268_v21 = vld.sshfl [vmem:[#allocation1 + $0x8] sm:$0xff pattern:$0x73625140] }
  0x28   :  { %595 = vmatpush.bf16.msra.mxu3 %v2831_v63  ;;  %v269_v22 = vld.sshfl [vmem:[#allocation1 + $0x10] sm:$0xff pattern:$0x73625140]  ;;  %v270_v23 = vld.sshfl [vmem:[#allocation1 + $0x18] sm:$0xff pattern:$0x73625140] }
  0x29   :  { %542 = vmatpush.bf16.msra.mxu0 %v2806_v6  ;;  %273 = vst [vmem:[#allocation1] ss:$4 sm:$0xff] %v158_v17  ;;  %v2861_v62 = vld [vmem:[%s3535_s4 + $0x78] sm:$0xff]  ;;  %v2860_v6 = vld [vmem:[%s3535_s4 + $0x70] sm:$0xff] }
  0x2a   :  { %560 = vmatpush.bf16.msra.mxu1 %v2814_v7  ;;  %275 = vst [vmem:[#allocation1 + $0x1] ss:$4 sm:$0xff] %v164_v19  ;;  %v271_v27 = vld.sshfl [vmem:[#allocation1 + $0x20] sm:$0xff pattern:$0x73625140]  ;;  %v2869_v7 = vld [vmem:[%s3535_s4 + $0xb8] sm:$0xff] }
  0x2b   :  { %578 = vmatpush.bf16.msra.mxu2 %v2822_v12  ;;  %277 = vst [vmem:[#allocation1 + $0x20] ss:$4 sm:$0xff] %v159_v24  ;;  %v2859_v12 = vld [vmem:[%s3535_s4 + $0x68] sm:$0xff] }
  0x2c   :  { %596 = vmatpush.bf16.msra.mxu3 %v2830_v13  ;;  %543 = vmatmul.bf16.vlgmr.msra.gmra.mxu0 %v267_v20  ;;  %279 = vst [vmem:[#allocation1 + $0x21] ss:$4 sm:$0xff] %v165_v25  ;;  %v2868_v13 = vld [vmem:[%s3535_s4 + $0xb0] sm:$0xff] }
  0x2d   :  { %607 = vmatpush.bf16.msrb.mxu0 %v2845_v14  ;;  %561 = vmatmul.bf16.vlgmr.msra.gmra.mxu1 %v268_v21 }
  0x2e   :  { %579 = vmatmul.bf16.vlgmr.msra.gmra.mxu2 %v269_v22  ;;  %1109 = vmatpush.bf16.msrb.mxu1 %v2853_v46  ;;  %v2858_v22 = vld [vmem:[%s3535_s4 + $0x60] sm:$0xff]  ;;  %v2884_v46 = vld [vmem:[%s3535_s4 + $0x130] sm:$0xff] }
  0x2f   :  { %597 = vmatmul.bf16.vlgmr.msra.gmra.mxu3 %v270_v23  ;;  %1123 = vmatpush.bf16.msrb.mxu2 %v2861_v62  ;;  %v2867_v23 = vld [vmem:[%s3535_s4 + $0xa8] sm:$0xff] }
  0x30   :  { %1137 = vmatpush.bf16.msrb.mxu3 %v2869_v7  ;;  %v2880_v7 = vld [vmem:[%s3535_s4 + $0x110] sm:$0xff] }
  0x31   :  { %608 = vmatpush.bf16.msrb.mxu0 %v2844_v18  ;;  %v280_v31 = vld.sshfl [vmem:[#allocation1] sm:$0xff pattern:$0x73625140]  ;;  %v281_v32 = vld.sshfl [vmem:[#allocation1 + $0x8] sm:$0xff pattern:$0x73625140] }
  0x32   :  { %v282_v33 = vld.sshfl [vmem:[#allocation1 + $0x10] sm:$0xff pattern:$0x73625140]  ;;  %v283_v34 = vld.sshfl [vmem:[#allocation1 + $0x18] sm:$0xff pattern:$0x73625140]  ;;  %1110 = vmatpush.bf16.msrb.mxu1 %v2852_v49 }
  0x33   :  { %v284_v37 = vld.sshfl [vmem:[#allocation1 + $0x20] sm:$0xff pattern:$0x73625140]  ;;  %1124 = vmatpush.bf16.msrb.mxu2 %v2860_v6  ;;  %v2847_v18 = vld [vmem:[%s3535_s4 + $0x8] sm:$0xff] }
  0x34   :  { %1138 = vmatpush.bf16.msrb.mxu3 %v2868_v13  ;;  %v2879_v13 = vld [vmem:[%s3535_s4 + $0x108] sm:$0xff] }
  0x35   :  { %609 = vmatpush.bf16.msrb.mxu0 %v2843_v26  ;;  %v2846_v26 = vld [vmem:[%s3535_s4] sm:$0xff] }
  0x36   :  { %1111 = vmatpush.bf16.msrb.mxu1 %v2851_v55 }
  0x37   :  { %1125 = vmatpush.bf16.msrb.mxu2 %v2859_v12  ;;  %v2871_v12 = vld [vmem:[%s3535_s4 + $0xc8] sm:$0xff] }
  0x38   :  { %1139 = vmatpush.bf16.msrb.mxu3 %v2867_v23 }
  0x39   :  { %610 = vmatpush.bf16.msrb.mxu0 %v2842_v28 }
  0x3a   :  { %1112 = vmatpush.bf16.msrb.mxu1 %v2850_v57 }
  0x3b   :  { %1126 = vmatpush.bf16.msrb.mxu2 %v2858_v22 }
  0x3c   :  { %548 = vmatmul.bf16.gmra.mxu0 %v280_v31 }
  0x3d   :  { %611 = vmatpush.bf16.msrb.mxu0 %v2841_v29  ;;  %566 = vmatmul.bf16.gmra.mxu1 %v281_v32 }
  0x3e   :  { %584 = vmatmul.bf16.gmra.mxu2 %v282_v33  ;;  %1113 = vmatpush.bf16.msrb.mxu1 %v2849_v3  ;;  %v2877_v33 = vld [vmem:[%s3535_s4 + $0xf8] sm:$0xff] }
  0x3f   :  { %602 = vmatmul.bf16.gmra.mxu3 %v283_v34  ;;  %v2857_v34 = vld [vmem:[%s3535_s4 + $0x58] sm:$0xff] }
  0x40   :  { %1127 = vmatpush.bf16.msrb.mxu2 %v2857_v34  ;;  %v2881_v3 = vld [vmem:[%s3535_s4 + $0x118] sm:$0xff] }
  0x41   :  { %612 = vmatpush.bf16.msrb.mxu0 %v2840_v30 }
  0x42   :  { %1114 = vmatpush.bf16.msrb.mxu1 %v2848_v9 }
  0x45   :  { %613 = vmatpush.bf16.msrb.mxu0 %v2839_v35  ;;  %v2866_v35 = vld [vmem:[%s3535_s4 + $0xa0] sm:$0xff] }
  0x46   :  { %1115 = vmatpush.bf16.msrb.mxu1 %v2847_v18  ;;  %1140 = vmatpush.bf16.msrb.mxu3 %v2866_v35 }
  0x49   :  { %614 = vmatpush.bf16.msrb.mxu0 %v2838_v36 }
  0x4a   :  { %1116 = vmatpush.bf16.msrb.mxu1 %v2846_v26 }
  0x4c   :  { %615 = vmatmul.bf16.vlgmr.msrb.gmra.mxu0 %v271_v27 }
  0x4d   :  { %1151 = vmatpush.bf16.msra.mxu0 %v2877_v33 }
  0x5c   :  { %620 = vmatmul.bf16.gmra.mxu0 %v284_v37 }
  0xa9   :  { %v544_v38 = vpop.f32.mrf.mxu0 }
  0xaa   :  { %v562_v39 = vpop.f32.mrf.mxu1 }
  0xab   :  { %v563_v54 = vadd.f32 %v562_v39, %v544_v38  ;;  %v2885_v38 = vld [vmem:[%s3535_s4 + $0x138] sm:$0xff] }
  0xac   :  { %1165 = vmatpush.bf16.msra.mxu1 %v2885_v38 }
  0xb0   :  { %1166 = vmatpush.bf16.msra.mxu1 %v2884_v46 }
  0xb1   :  { %v580_v40 = vpop.f32.mrf.mxu2  ;;  %v546_v42 = vpop.f32.mrf.mxu0 }
  0xb2   :  { %v598_v41 = vpop.f32.mrf.mxu3  ;;  %v564_v43 = vpop.f32.mrf.mxu1  ;;  %v581_v56 = vadd.f32 %v580_v40, %v563_v54  ;;  %v2864_v54 = vld [vmem:[%s3535_s4 + $0x90] sm:$0xff] }
  0xb3   :  { %v565_v0 = vadd.f32 %v564_v43, %v546_v42  ;;  %v2856_v42 = vld [vmem:[%s3535_s4 + $0x50] sm:$0xff]  ;;  %v2865_v43 = vld [vmem:[%s3535_s4 + $0x98] sm:$0xff] }
  0xb4   :  { %v599_v58 = vadd.f32 %v598_v41, %v581_v56  ;;  %v2876_v41 = vld [vmem:[%s3535_s4 + $0xf0] sm:$0xff]  ;;  %1128 = vmatpush.bf16.msrb.mxu2 %v2856_v42  ;;  %1141 = vmatpush.bf16.msrb.mxu3 %v2865_v43  ;;  %v2883_v56 = vld [vmem:[%s3535_s4 + $0x128] sm:$0xff] }
  0xb5   :  { %1152 = vmatpush.bf16.msra.mxu0 %v2876_v41  ;;  %1167 = vmatpush.bf16.msra.mxu1 %v2883_v56  ;;  %v2893_v56 = vld [vmem:[#allocation2 + $0x38] sm:$0xff] }
  0xb8   :  { %1142 = vmatpush.bf16.msrb.mxu3 %v2864_v54 }
  0xb9   :  { %v582_v44 = vpop.f32.mrf.mxu2  ;;  %v549_v47 = vpop.f32.mrf.mxu0 }
  0xba   :  { %v600_v45 = vpop.f32.mrf.mxu3  ;;  %v567_v48 = vpop.f32.mrf.mxu1  ;;  %v583_v4 = vadd.f32 %v582_v44, %v565_v0 }
  0xbb   :  { %v568_v15 = vadd.f32 %v567_v48, %v549_v47 }
  0xbc   :  { %v601_v10 = vadd.f32 %v600_v45, %v583_v4 }
  0xc1   :  { %v585_v50 = vpop.f32.mrf.mxu2  ;;  %v551_v52 = vpop.f32.mrf.mxu0 }
  0xc2   :  { %v603_v51 = vpop.f32.mrf.mxu3  ;;  %v569_v53 = vpop.f32.mrf.mxu1  ;;  %v586_v20 = vadd.f32 %v585_v50, %v568_v15  ;;  %v2875_v50 = vld [vmem:[%s3535_s4 + $0xe8] sm:$0xff]  ;;  %v2870_v15 = vld [vmem:[%s3535_s4 + $0xc0] sm:$0xff] }
  0xc3   :  { %1153 = vmatpush.bf16.msra.mxu0 %v2875_v50 }
  0xc4   :  { %v604_v29 = vadd.f32 %v603_v51, %v586_v20  ;;  %v2855_v51 = vld [vmem:[%s3535_s4 + $0x48] sm:$0xff] }
  0xc5   :  { %1129 = vmatpush.bf16.msrb.mxu2 %v2855_v51 }
  0xc9   :  { %v587_v60 = vpop.f32.mrf.mxu2  ;;  %v616_v63 = vpop.f32.mrf.mxu0 }
  0xca   :  { %v605_v61 = vpop.f32.mrf.mxu3  ;;  %v617_v1 = vadd.f32 %v616_v63, %v599_v58  ;;  %v2854_v60 = vld [vmem:[%s3535_s4 + $0x40] sm:$0xff] }
  0xcb   :  { %v2863_v61 = vld [vmem:[%s3535_s4 + $0x88] sm:$0xff]  ;;  %v2882_v63 = vld [vmem:[%s3535_s4 + $0x120] sm:$0xff]  ;;  %1130 = vmatpush.bf16.msrb.mxu2 %v2854_v60 }
  0xcc   :  { %v629_v5 = vmul.f32 %v3320_v59, %v617_v1  ;;  %1143 = vmatpush.bf16.msrb.mxu3 %v2863_v61  ;;  %1168 = vmatpush.bf16.msra.mxu1 %v2882_v63  ;;  %v2873_v1 = vld [vmem:[%s3535_s4 + $0xd8] sm:$0xff]  ;;  %v2901_v60 = vld [vmem:[#allocation2 + $0x78] sm:$0xff] }
  0xcd   :  { %v2909_v61 = vld [vmem:[#allocation2 + $0xb8] sm:$0xff] }
  0xce   :  { %v636_v8 = vadd.f32 %v2972_v2, %v629_v5  ;;  %v2872_v5 = vld [vmem:[%s3535_s4 + $0xd0] sm:$0xff]  ;;  %v2889_v63 = vld [vmem:[#allocation2 + $0x18] sm:$0xff] }
  0xcf   :  { %1588 = vmatpush.bf16.msra.mxu2 %v2893_v56 }
  0xd0   :  { %vm639_vm6 = vcmp.ge.f32.partialorder %v636_v8, 0.0  ;;  %v642_v11 = vmul.f32 0.01, %v636_v8  ;;  %1169 = vmatpush.bf16.msra.mxu1 %v2881_v3  ;;  %v2916_v3 = vld [vmem:[#allocation2 + $0xf0] sm:$0xff] }
  0xd1   :  { %v618_v14 = vpop.f32.mrf.mxu0 }
  0xd2   :  { %v645_v16 = vsel %vm639_vm6, %v636_v8, %v642_v11  ;;  %v619_v17 = vadd.f32 %v618_v14, %v601_v10 }
  0xd3   :  { %v648_v19 = vpack.c.bf16 %v645_v16, %v645_v16 }
  0xd4   :  { %v630_v21 = vmul.f32 %v3320_v59, %v619_v17  ;;  %1170 = vmatpush.bf16.msra.mxu1 %v2880_v7  ;;  %v2878_v17 = vld [vmem:[%s3535_s4 + $0x100] sm:$0xff]  ;;  %v2915_v7 = vld [vmem:[#allocation2 + $0xe8] sm:$0xff] }
  0xd5   :  { %v654_v24 = vrot.slane %v648_v19, 2 }
  0xd6   :  { %v637_v25 = vadd.f32 %v2972_v2, %v630_v21 }
  0xd7   :  { %v3361_v27 = vsel %vm124_vm0, %v648_v19, %v654_v24  ;;  %v660_v28 = vsel %vm133_vm2, %v648_v19, %v654_v24 }
  0xd8   :  { %v3364_v30 = vrot.slane %v660_v28, 2  ;;  %675 = vst [vmem:[#allocation1] ss:$4 sm:$0xff] %v3361_v27  ;;  %vm640_vm7 = vcmp.ge.f32.partialorder %v637_v25, 0.0  ;;  %v643_v31 = vmul.f32 0.01, %v637_v25  ;;  %1171 = vmatpush.bf16.msra.mxu1 %v2879_v13 }
  0xd9   :  { %v621_v32 = vpop.f32.mrf.mxu0 }
  0xda   :  { %678 = vst [vmem:[#allocation1 + $0x1] ss:$4 sm:$0xff] %v3364_v30  ;;  %v646_v36 = vsel %vm640_vm7, %v637_v25, %v643_v31  ;;  %v622_v37 = vadd.f32 %v621_v32, %v604_v29 }
  0xdb   :  { %v649_v39 = vpack.c.bf16 %v646_v36, %v646_v36 }
  0xdc   :  { %v631_v40 = vmul.f32 %v3320_v59, %v622_v37  ;;  %v2874_v59 = vld [vmem:[%s3535_s4 + $0xe0] sm:$0xff]  ;;  %1172 = vmatpush.bf16.msra.mxu1 %v2878_v17 }
  0xdd   :  { %v655_v44 = vrot.slane %v649_v39, 2  ;;  %1154 = vmatpush.bf16.msra.mxu0 %v2874_v59  ;;  %v2890_v59 = vld [vmem:[#allocation2 + $0x20] sm:$0xff]  ;;  %v2897_v17 = vld [vmem:[#allocation2 + $0x58] sm:$0xff] }
  0xde   :  { %v638_v45 = vadd.f32 %v2972_v2, %v631_v40  ;;  %v2862_v2 = vld [vmem:[%s3535_s4 + $0x80] sm:$0xff]  ;;  %s3061_s4 = smov [#allocation7]  }
  0xdf   :  { %v666_v47 = vsel %vm133_vm2, %v649_v39, %v655_v44  ;;  %v3411_v58 = vsel %vm124_vm0, %v649_v39, %v655_v44  ;;  %1144 = vmatpush.bf16.msrb.mxu3 %v2862_v2  ;;  %v2908_v2 = vld [vmem:[#allocation2 + $0xb0] sm:$0xff]  ;;  %s2141_s29 = sshll.u32 %s3061_s4, 4  ;;  %s2142_s29 = int_to_ptr.vmem [resolvable:$true] %s2141_s29 }
  0xe0   :  { %v3394_v48 = vrot.slane %v666_v47, 2  ;;  %vm641_vm8 = vcmp.ge.f32.partialorder %v638_v45, 0.0  ;;  %v644_v49 = vmul.f32 0.01, %v638_v45 }
  0xe1   :  { %v679_v52 = vld.sshfl [vmem:[#allocation1] sm:$0xff pattern:$0x73625140]  ;;  %v623_v53 = vpop.f32.mrf.mxu0  ;;  %1155 = vmatpush.bf16.msra.mxu0 %v2873_v1  ;;  %v2900_v1 = vld [vmem:[#allocation2 + $0x70] sm:$0xff] }
  0xe2   :  { %688 = vst [vmem:[#allocation1] ss:$4 sm:$0xff] %v3361_v27  ;;  %v647_v55 = vsel %vm641_vm8, %v638_v45, %v644_v49  ;;  %v769_v10 = vunpack.c.l.b16 %v679_v52 }
  0xe3   :  { %690 = vst [vmem:[#allocation1 + $0x1] ss:$4 sm:$0xff] %v3364_v30  ;;  %v650_v57 = vpack.c.bf16 %v647_v55, %v647_v55  ;;  %1601 = vmatpush.bf16.msra.mxu3 %v2901_v60 }
  0xe4   :  { %683 = vst [vmem:[#allocation1 + $0x20] ss:$4 sm:$0xff] %v3394_v48 }
  0xe5   :  { %692 = vst [vmem:[#allocation1 + $0x2] ss:$4 sm:$0xff] %v3411_v58  ;;  %v656_v62 = vrot.slane %v650_v57, 2  ;;  %1156 = vmatpush.bf16.msra.mxu0 %v2872_v5  ;;  %v2899_v5 = vld [vmem:[#allocation2 + $0x68] sm:$0xff] }
  0xe7   :  { %v3428_v0 = vsel %vm124_vm0, %v650_v57, %v656_v62  ;;  %v672_v6 = vsel %vm133_vm2, %v650_v57, %v656_v62  ;;  %v2892_v57 = vld [vmem:[#allocation2 + $0x30] sm:$0xff]  ;;  %v2917_v62 = vld [vmem:[#allocation2 + $0xf8] sm:$0xff]  ;;  %1602 = vmatpush.bf16.msra.mxu3 %v2900_v1 }
  0xe8   :  { %685 = vst [vmem:[#allocation1 + $0x21] ss:$4 sm:$0xff] %v3428_v0  ;;  %v674_v9 = vrot.slane %v672_v6, 2  ;;  %1589 = vmatpush.bf16.msra.mxu2 %v2892_v57  ;;  %v2907_v6 = vld [vmem:[#allocation2 + $0xa8] sm:$0xff]  ;;  %v2920_v57 = vld [vmem:[#allocation2 + $0x110] sm:$0xff] }
  0xe9   :  { %1157 = vmatpush.bf16.msra.mxu0 %v2871_v12  ;;  %v2914_v12 = vld [vmem:[#allocation2 + $0xe0] sm:$0xff] }
  0xeb   :  { %1603 = vmatpush.bf16.msra.mxu3 %v2899_v5 }
  0xec   :  { %v693_v4 = vld.sshfl [vmem:[#allocation1] sm:$0xff pattern:$0x73625140] }
  0xed   :  { %718 = vst [vmem:[#allocation1 + $0x2] ss:$4 sm:$0xff] %v3411_v58  ;;  %v704_v16 = vshll.u32 %v693_v4, 16  ;;  %1158 = vmatpush.bf16.msra.mxu0 %v2870_v15  ;;  %v702_v21 = vshrl.u32 %v693_v4, 16  ;;  %v2888_v4 = vld [vmem:[#allocation2 + $0x10] sm:$0xff]  ;;  %v2886_v15 = vld [vmem:[#allocation2] sm:$0xff] }
  0xee   :  { %714 = vst [vmem:[#allocation1] ss:$4 sm:$0xff] %v3361_v27 }
  0xef   :  { %716 = vst [vmem:[#allocation1 + $0x1] ss:$4 sm:$0xff] %v3364_v30  ;;  %v686_v8 = vld.sshfl [vmem:[#allocation1 + $0x20] sm:$0xff pattern:$0x73625140]  ;;  %v706_v19 = vrot.slane %v704_v16, 1 }
  0xf0   :  { %695 = vst [vmem:[#allocation1 + $0x20] ss:$4 sm:$0xff] %v3394_v48  ;;  %v774_v11 = vunpack.c.l.b16 %v686_v8 }
  0xf1   :  { %697 = vst [vmem:[#allocation1 + $0x21] ss:$4 sm:$0xff] %v3428_v0  ;;  %v707_v23 = vor.u32 %v706_v19, %v702_v21  ;;  %1614 = vmatpush.bf16.msrb.mxu0 %v2909_v61  ;;  %v2913_v19 = vld [vmem:[#allocation2 + $0xd8] sm:$0xff] }
  0xf2   :  { %700 = vst [vmem:[#allocation1 + $0x22] ss:$4 sm:$0xff] %v674_v9  ;;  %v859_v14 = vpack.c.b16 %v774_v11, %v769_v10  ;;  %v2898_v10 = vld [vmem:[#allocation2 + $0x60] sm:$0xff] }
  0xf3   :  { %v2906_v11 = vld [vmem:[#allocation2 + $0xa0] sm:$0xff]  ;;  %1604 = vmatpush.bf16.msra.mxu3 %v2898_v10 }
  0xf4   :  { %1117 = vmatmul.bf16.vlgmr.msrb.gmra.mxu1 %v859_v14 }
  0xf5   :  { %1627 = vmatpush.bf16.msrb.mxu1 %v2917_v62  ;;  %1615 = vmatpush.bf16.msrb.mxu0 %v2908_v2 }
  0xf6   :  { %v719_v18 = vld.sshfl [vmem:[#allocation1] sm:$0xff pattern:$0x73625140] }
  0xf7   :  { %731 = vst [vmem:[#allocation1] ss:$4 sm:$0xff] %v3361_v27  ;;  %v770_v27 = vunpack.c.l.b16 %v707_v23  ;;  %v729_v32 = vrot.slane %v719_v18, 1  ;;  %v2905_v18 = vld [vmem:[#allocation2 + $0x98] sm:$0xff]  ;;  %1605 = vmatpush.bf16.msra.mxu3 %v2897_v17 }
  0xf8   :  { %733 = vst [vmem:[#allocation1 + $0x1] ss:$4 sm:$0xff] %v3364_v30 }
  0xf9   :  { %v701_v20 = vld.sshfl [vmem:[#allocation1 + $0x20] sm:$0xff pattern:$0x73625140]  ;;  %735 = vst [vmem:[#allocation1 + $0x2] ss:$4 sm:$0xff] %v3411_v58  ;;  %v771_v35 = vunpack.c.l.b16 %v729_v32  ;;  %1628 = vmatpush.bf16.msrb.mxu1 %v2916_v3  ;;  %1616 = vmatpush.bf16.msrb.mxu0 %v2907_v6 }
  0xfa   :  { %722 = vst [vmem:[#allocation1 + $0x20] ss:$4 sm:$0xff] %v3394_v48  ;;  %v710_v22 = vshll.u32 %v701_v20, 16  ;;  %v708_v24 = vshrl.u32 %v701_v20, 16  ;;  %v2925_v20 = vld [vmem:[#allocation2 + $0x138] sm:$0xff] }
  0xfb   :  { %724 = vst [vmem:[#allocation1 + $0x21] ss:$4 sm:$0xff] %v3428_v0 }
  0xfc   :  { %726 = vst [vmem:[#allocation1 + $0x22] ss:$4 sm:$0xff] %v674_v9  ;;  %v712_v25 = vrot.slane %v710_v22, 1 }
  0xfd   :  { %1629 = vmatpush.bf16.msrb.mxu1 %v2915_v7  ;;  %1617 = vmatpush.bf16.msrb.mxu0 %v2906_v11 }
  0xfe   :  { %v713_v26 = vor.u32 %v712_v25, %v708_v24  ;;  %v2896_v24 = vld [vmem:[#allocation2 + $0x50] sm:$0xff] }
  0xff   :  { %v2904_v25 = vld [vmem:[#allocation2 + $0x90] sm:$0xff]  ;;  %1606 = vmatpush.bf16.msra.mxu3 %v2896_v24 }
 0x100   :  { %v775_v28 = vunpack.c.l.b16 %v713_v26  ;;  %v736_v29 = vld.sshfl [vmem:[#allocation1] sm:$0xff pattern:$0x73625140]  ;;  %v2912_v26 = vld [vmem:[#allocation2 + $0xd0] sm:$0xff] }
 0x101   :  { %758 = vst [vmem:[#allocation1] ss:$4 sm:$0xff] %v3364_v30  ;;  %v744_v38 = vshrl.u32 %v736_v29, 16  ;;  %v747_v39 = vshll.u32 %v736_v29, 16  ;;  %1630 = vmatpush.bf16.msrb.mxu1 %v2914_v12  ;;  %1618 = vmatpush.bf16.msrb.mxu0 %v2905_v18  ;;  %v2924_v29 = vld [vmem:[#allocation2 + $0x130] sm:$0xff] }
 0x102   :  { %v860_v31 = vpack.c.b16 %v775_v28, %v770_v27  ;;  %760 = vst [vmem:[#allocation1 + $0x1] ss:$4 sm:$0xff] %v3411_v58  ;;  %v2891_v58 = vld [vmem:[#allocation2 + $0x28] sm:$0xff]  ;;  %v2973_v28 = vld [vmem:[%s3536_s5] ss:$0 sm:$0xff]  ;;  %s2143_s5 = sshll.u32 %s3545_s14, 4  ;;  %s2144_s5 = int_to_ptr.hbm [resolvable:$true] %s2143_s5 }
 0x103   :  { %v727_v33 = vld.sshfl [vmem:[#allocation1 + $0x20] sm:$0xff pattern:$0x73625140]  ;;  %v746_v40 = vrot.slane %v744_v38, 1  ;;  %v749_v30 = vrot.slane %v747_v39, 2  ;;  %1590 = vmatpush.bf16.msra.mxu2 %v2891_v58  ;;  %v2911_v38 = vld [vmem:[#allocation2 + $0xc8] sm:$0xff] }
 0x104   :  { %738 = vst [vmem:[#allocation1 + $0x20] ss:$4 sm:$0xff] %v3394_v48  ;;  %1131 = vmatmul.bf16.vlgmr.msrb.gmra.mxu2 %v860_v31  ;;  %v730_v34 = vrot.slane %v727_v33, 1 }
 0x105   :  { %740 = vst [vmem:[#allocation1 + $0x21] ss:$4 sm:$0xff] %v3428_v0  ;;  %v750_v44 = vor.u32 %v749_v30, %v746_v40  ;;  %1631 = vmatpush.bf16.msrb.mxu1 %v2913_v19  ;;  %1619 = vmatpush.bf16.msrb.mxu0 %v2904_v25  ;;  %v2923_v40 = vld [vmem:[#allocation2 + $0x128] sm:$0xff] }
 0x106   :  { %742 = vst [vmem:[#allocation1 + $0x22] ss:$4 sm:$0xff] %v674_v9  ;;  %v776_v36 = vunpack.c.l.b16 %v730_v34  ;;  %v2974_v34 = vld [vmem:[%s3537_s6] ss:$0 sm:$0xff] }
 0x107   :  { %v772_v48 = vunpack.c.l.b16 %v750_v44  ;;  %1591 = vmatpush.bf16.msra.mxu2 %v2890_v59 }
 0x108   :  { %v861_v37 = vpack.c.b16 %v776_v36, %v771_v35  ;;  %v2895_v36 = vld [vmem:[#allocation2 + $0x48] sm:$0xff] }
 0x109   :  { %v761_v50 = vld.sshfl [vmem:[#allocation1] sm:$0xff pattern:$0x73625140]  ;;  %1632 = vmatpush.bf16.msrb.mxu1 %v2912_v26  ;;  %1607 = vmatpush.bf16.msra.mxu3 %v2895_v36 }
 0x10a   :  { %1145 = vmatmul.bf16.vlgmr.msrb.gmra.mxu3 %v861_v37  ;;  %v773_v53 = vunpack.c.l.b16 %v761_v50  ;;  %v2903_v37 = vld [vmem:[#allocation2 + $0x88] sm:$0xff]  ;;  %v2941_v36 = vld [vmem:[#allocation5 + $0x78] sm:$0xff] }
 0x10b   :  { %1592 = vmatpush.bf16.msra.mxu2 %v2889_v63  ;;  %1620 = vmatpush.bf16.msrb.mxu0 %v2903_v37  ;;  %v2940_v37 = vld [vmem:[#allocation5 + $0x70] sm:$0xff] }
 0x10d   :  { %v743_v41 = vld.sshfl [vmem:[#allocation1 + $0x20] sm:$0xff pattern:$0x73625140]  ;;  %1633 = vmatpush.bf16.msrb.mxu1 %v2911_v38  ;;  %v2939_v38 = vld [vmem:[#allocation5 + $0x68] sm:$0xff] }
 0x10e   :  { %764 = vst [vmem:[#allocation1 + $0x20] ss:$4 sm:$0xff] %v3428_v0  ;;  %v751_v42 = vshrl.u32 %v743_v41, 16  ;;  %v754_v43 = vshll.u32 %v743_v41, 16  ;;  %v2894_v41 = vld [vmem:[#allocation2 + $0x40] sm:$0xff] }
 0x10f   :  { %766 = vst [vmem:[#allocation1 + $0x21] ss:$4 sm:$0xff] %v674_v9  ;;  %1593 = vmatpush.bf16.msra.mxu2 %v2888_v4  ;;  %v2887_v9 = vld [vmem:[#allocation2 + $0x8] sm:$0xff]  ;;  %1608 = vmatpush.bf16.msra.mxu3 %v2894_v41 }
 0x110   :  { %v753_v45 = vrot.slane %v751_v42, 1  ;;  %v756_v46 = vrot.slane %v754_v43, 2  ;;  %v2902_v42 = vld [vmem:[#allocation2 + $0x80] sm:$0xff] }
 0x111   :  { %1621 = vmatpush.bf16.msrb.mxu0 %v2902_v42  ;;  %v2932_v42 = vld [vmem:[#allocation5 + $0x30] sm:$0xff] }
 0x112   :  { %v757_v47 = vor.u32 %v756_v46, %v753_v45  ;;  %v2910_v45 = vld [vmem:[#allocation2 + $0xc0] sm:$0xff] }
 0x113   :  { %1594 = vmatpush.bf16.msra.mxu2 %v2887_v9  ;;  %v2922_v46 = vld [vmem:[#allocation2 + $0x120] sm:$0xff]  ;;  %1634 = vmatpush.bf16.msrb.mxu1 %v2910_v45 }
 0x114   :  { %v777_v49 = vunpack.c.l.b16 %v757_v47  ;;  %1771 = vmatpush.bf16.msrb.mxu3 %v2941_v36 }
 0x116   :  { %v862_v51 = vpack.c.b16 %v777_v49, %v772_v48  ;;  %v767_v52 = vld.sshfl [vmem:[#allocation1 + $0x20] sm:$0xff pattern:$0x73625140] }
 0x117   :  { %v778_v54 = vunpack.c.l.b16 %v767_v52  ;;  %1595 = vmatpush.bf16.msra.mxu2 %v2886_v15 }
 0x118   :  { %1159 = vmatmul.bf16.vlgmr.msra.gmra.mxu0 %v862_v51  ;;  %1772 = vmatpush.bf16.msrb.mxu3 %v2940_v37 }
 0x119   :  { %v863_v55 = vpack.c.b16 %v778_v54, %v773_v53  ;;  %v2921_v53 = vld [vmem:[#allocation2 + $0x118] sm:$0xff] }
 0x11b   :  { %1173 = vmatmul.bf16.vlgmr.msra.gmra.mxu1 %v863_v55  ;;  %1640 = vmatpush.bf16.msrb.mxu2 %v2925_v20 }
 0x11c   :  { %1773 = vmatpush.bf16.msrb.mxu3 %v2939_v38 }
 0x11f   :  { %1641 = vmatpush.bf16.msrb.mxu2 %v2924_v29 }
 0x123   :  { %1642 = vmatpush.bf16.msrb.mxu2 %v2923_v40  ;;  %v2938_v40 = vld [vmem:[#allocation5 + $0x60] sm:$0xff] }
 0x124   :  { %1774 = vmatpush.bf16.msrb.mxu3 %v2938_v40 }
 0x127   :  { %1643 = vmatpush.bf16.msrb.mxu2 %v2922_v46  ;;  %v2931_v46 = vld [vmem:[#allocation5 + $0x28] sm:$0xff] }
 0x12b   :  { %1644 = vmatpush.bf16.msrb.mxu2 %v2921_v53  ;;  %v2957_v53 = vld [vmem:[#allocation5 + $0xf8] sm:$0xff] }
 0x12f   :  { %1645 = vmatpush.bf16.msrb.mxu2 %v2920_v57  ;;  %v2947_v57 = vld [vmem:[#allocation5 + $0xa8] sm:$0xff] }
 0x171   :  { %v1118_v0 = vpop.f32.mrf.mxu1 }
 0x179   :  { %v1120_v14 = vpop.f32.mrf.mxu1 }
 0x187   :  { %v1132_v8 = vpop.f32.mrf.mxu2 }
 0x188   :  { %v1133_v16 = vadd.f32 %v1132_v8, %v1118_v0  ;;  %v2919_v0 = vld [vmem:[#allocation2 + $0x108] sm:$0xff]  ;;  %v2918_v8 = vld [vmem:[#allocation2 + $0x100] sm:$0xff] }
 0x189   :  { %1646 = vmatpush.bf16.msrb.mxu2 %v2919_v0 }
 0x18d   :  { %v1146_v13 = vpop.f32.mrf.mxu3  ;;  %1647 = vmatpush.bf16.msrb.mxu2 %v2918_v8 }
 0x18e   :  { %v1147_v21 = vadd.f32 %v1146_v13, %v1133_v16 }
 0x18f   :  { %v1134_v27 = vpop.f32.mrf.mxu2 }
 0x190   :  { %v1135_v35 = vadd.f32 %v1134_v27, %v1120_v14 }
 0x195   :  { %v1160_v22 = vpop.f32.mrf.mxu0  ;;  %v1148_v32 = vpop.f32.mrf.mxu3 }
 0x196   :  { %v1161_v23 = vadd.f32 %v1160_v22, %v1147_v21  ;;  %v1149_v30 = vadd.f32 %v1148_v32, %v1135_v35 }
 0x198   :  { %v1174_v31 = vpop.f32.mrf.mxu1 }
 0x199   :  { %v1175_v33 = vadd.f32 %v1174_v31, %v1161_v23 }
 0x19b   :  { %v1183_v39 = vmul.f32 %v2973_v28, %v1175_v33 }
 0x19d   :  { %v1189_v43 = vadd.f32 %v2974_v34, %v1183_v39  ;;  %v1162_v44 = vpop.f32.mrf.mxu0  ;;  %v2933_v39 = vld [vmem:[#allocation5 + $0x38] sm:$0xff] }
 0x19e   :  { %v1163_v47 = vadd.f32 %v1162_v44, %v1149_v30  ;;  %1845 = vmatpush.bf16.msra.mxu0 %v2933_v39 }
 0x19f   :  { %vm1191_vm9 = vcmp.ge.f32.partialorder %v1189_v43, 0.0  ;;  %v1193_v48 = vmul.f32 0.01, %v1189_v43 }
 0x1a0   :  { %v1176_v49 = vpop.f32.mrf.mxu1 }
 0x1a1   :  { %v1195_v50 = vsel %vm1191_vm9, %v1189_v43, %v1193_v48  ;;  %v1177_v51 = vadd.f32 %v1176_v49, %v1163_v47  ;;  %v2937_v43 = vld [vmem:[#allocation5 + $0x58] sm:$0xff]  ;;  %v2936_v48 = vld [vmem:[#allocation5 + $0x50] sm:$0xff]  ;;  %v2930_v49 = vld [vmem:[#allocation5 + $0x20] sm:$0xff] }
 0x1a2   :  { %v1197_v52 = vpack.c.bf16 %v1195_v50, %v1195_v50  ;;  %1846 = vmatpush.bf16.msra.mxu0 %v2932_v42  ;;  %1775 = vmatpush.bf16.msrb.mxu3 %v2937_v43  ;;  %v2949_v47 = vld [vmem:[#allocation5 + $0xb8] sm:$0xff]  ;;  %v2948_v50 = vld [vmem:[#allocation5 + $0xb0] sm:$0xff] }
 0x1a3   :  { %v1184_v54 = vmul.f32 %v2973_v28, %v1177_v51  ;;  %1937 = vmatpush.bf16.msra.mxu1 %v2949_v47 }
 0x1a4   :  { %v1201_v55 = vunpack.c.l.b16 %v1197_v52 }
 0x1a5   :  { %v1190_v56 = vadd.f32 %v2974_v34, %v1184_v54  ;;  %v2935_v54 = vld [vmem:[#allocation5 + $0x48] sm:$0xff] }
 0x1a6   :  { %v1203_v58 = vpack.c.b16 %v1201_v55, %v1201_v55  ;;  %1847 = vmatpush.bf16.msra.mxu0 %v2931_v46  ;;  %1776 = vmatpush.bf16.msrb.mxu3 %v2936_v48  ;;  %v2956_v55 = vld [vmem:[#allocation5 + $0xf0] sm:$0xff] }
 0x1a7   :  { %vm1192_vm10 = vcmp.ge.f32.partialorder %v1190_v56, 0.0  ;;  %v1194_v59 = vmul.f32 0.01, %v1190_v56  ;;  %1938 = vmatpush.bf16.msra.mxu1 %v2948_v50 }
 0x1a8   :  { %v1206_v60 = vshrl.u32 %v1203_v58, 16  ;;  %v1208_v61 = vshll.u32 %v1203_v58, 16  ;;  %v1227_v62 = vrot.slane %v1203_v58, 2  ;;  %v2482_v10 = vrot.slane %v1203_v58, 5 }
 0x1a9   :  { %v1196_v63 = vsel %vm1192_vm10, %v1190_v56, %v1194_v59  ;;  %v2929_v56 = vld [vmem:[#allocation5 + $0x18] sm:$0xff] }
 0x1aa   :  { %v1210_v1 = vrot.slane %v1208_v61, 1  ;;  %v1221_v2 = vrot.slane %v1206_v60, 1  ;;  %v1222_v3 = vrot.slane %v1208_v61, 2  ;;  %1334 = vst [vmem:[#allocation1 + $0x20] ss:$4 sm:$0xff] %v1227_v62  ;;  %v1198_v4 = vpack.c.bf16 %v1196_v63, %v1196_v63  ;;  %1848 = vmatpush.bf16.msra.mxu0 %v2930_v49  ;;  %1777 = vmatpush.bf16.msrb.mxu3 %v2935_v54  ;;  %v2934_v61 = vld [vmem:[#allocation5 + $0x40] sm:$0xff] }
 0x1ab   :  { %1939 = vmatpush.bf16.msra.mxu1 %v2947_v57  ;;  %v2928_v62 = vld [vmem:[#allocation5 + $0x10] sm:$0xff]  ;;  %v2946_v63 = vld [vmem:[#allocation5 + $0xa0] sm:$0xff] }
 0x1ac   :  { %v1211_v5 = vor.u32 %v1210_v1, %v1206_v60  ;;  %v1223_v6 = vor.u32 %v1222_v3, %v1221_v2  ;;  %v1202_v7 = vunpack.c.l.b16 %v1198_v4  ;;  %v2927_v1 = vld [vmem:[#allocation5 + $0x8] sm:$0xff]  ;;  %v2945_v2 = vld [vmem:[#allocation5 + $0x98] sm:$0xff] }
 0x1ad   :  { %v2955_v3 = vld [vmem:[#allocation5 + $0xe8] sm:$0xff] }
 0x1ae   :  { %v1229_v9 = vrot.slane %v1211_v5, 6  ;;  %v1231_v11 = vrot.slane %v1223_v6, 2  ;;  %v1204_v12 = vpack.c.b16 %v1202_v7, %v1202_v7  ;;  %1849 = vmatpush.bf16.msra.mxu0 %v2929_v56  ;;  %1778 = vmatpush.bf16.msrb.mxu3 %v2934_v61  ;;  %v2975_v5 = vld [vmem:[%s3539_s8] ss:$0 sm:$0xff]  ;;  %v2954_v7 = vld [vmem:[#allocation5 + $0xe0] sm:$0xff] }
 0x1af   :  { %1940 = vmatpush.bf16.msra.mxu1 %v2946_v63  ;;  %v2962_v61 = vld [vmem:[%s3543_s12 + $0x20] sm:$0xff]  ;;  %v2960_v63 = vld [vmem:[%s3543_s12 + $0x10] sm:$0xff] }
 0x1b0   :  { %v1237_v13 = vsel %vm124_vm0, %v1197_v52, %v1229_v9  ;;  %v1240_v14 = vsel %vm127_vm1, %v2482_v10, %v1231_v11  ;;  %v1213_v15 = vshrl.u32 %v1204_v12, 16  ;;  %v1215_v16 = vshll.u32 %v1204_v12, 16  ;;  %v2976_v9 = vld [vmem:[%s3540_s9] ss:$0 sm:$0xff]  ;;  %v2926_v10 = vld [vmem:[#allocation5] sm:$0xff]  ;;  %v2944_v11 = vld [vmem:[#allocation5 + $0x90] sm:$0xff] }
 0x1b1   :  { %v1241_v17 = vsel %vm131_vm5, %v1237_v13, %v1240_v14  ;;  %v1228_v18 = vrot.slane %v1204_v12, 2  ;;  %v2483_v25 = vrot.slane %v1204_v12, 5 }
 0x1b2   :  { %1329 = vst [vmem:[#allocation1] ss:$4 sm:$0xff] %v1241_v17  ;;  %v1217_v19 = vrot.slane %v1215_v16, 1  ;;  %v1224_v20 = vrot.slane %v1213_v15, 1  ;;  %v1225_v21 = vrot.slane %v1215_v16, 2  ;;  %1850 = vmatpush.bf16.msra.mxu0 %v2928_v62  ;;  %v2943_v16 = vld [vmem:[#allocation5 + $0x88] sm:$0xff] }
 0x1b3   :  { %1337 = vst [vmem:[#allocation1 + $0x21] ss:$4 sm:$0xff] %v1228_v18  ;;  %1941 = vmatpush.bf16.msra.mxu1 %v2945_v2  ;;  %v2953_v17 = vld [vmem:[#allocation5 + $0xd8] sm:$0xff]  ;;  %v2961_v62 = vld [vmem:[%s3543_s12 + $0x18] sm:$0xff] }
 0x1b4   :  { %v1218_v22 = vor.u32 %v1217_v19, %v1213_v15  ;;  %v1226_v23 = vor.u32 %v1225_v21, %v1224_v20  ;;  %v2942_v20 = vld [vmem:[#allocation5 + $0x80] sm:$0xff]  ;;  %v2952_v21 = vld [vmem:[#allocation5 + $0xd0] sm:$0xff]  ;;  %v2958_v2 = vld [vmem:[%s3543_s12] sm:$0xff] }
 0x1b6   :  { %v1232_v24 = vrot.slane %v1218_v22, 6  ;;  %v1234_v26 = vrot.slane %v1226_v23, 2  ;;  %1851 = vmatpush.bf16.msra.mxu0 %v2927_v1 }
 0x1b7   :  { %1942 = vmatpush.bf16.msra.mxu1 %v2944_v11 }
 0x1b8   :  { %v1244_v27 = vsel %vm124_vm0, %v1198_v4, %v1232_v24  ;;  %v1247_v28 = vsel %vm127_vm1, %v2483_v25, %v1234_v26  ;;  %v2951_v26 = vld [vmem:[#allocation5 + $0xc8] sm:$0xff] }
 0x1b9   :  { %v1248_v29 = vsel %vm131_vm5, %v1244_v27, %v1247_v28  ;;  %v2950_v27 = vld [vmem:[#allocation5 + $0xc0] sm:$0xff] }
 0x1ba   :  { %1331 = vst [vmem:[#allocation1 + $0x1] ss:$4 sm:$0xff] %v1248_v29  ;;  %v1342_v35 = vld.sshfl [vmem:[#allocation1 + $0x20] sm:$0xff pattern:$0x73625140]  ;;  %1852 = vmatpush.bf16.msra.mxu0 %v2926_v10 }
 0x1bb   :  { %1943 = vmatpush.bf16.msra.mxu1 %v2943_v16  ;;  %v2977_v10 = vld [vmem:[%s3542_s11] ss:$0 sm:$0xff] }
 0x1bf   :  { %1944 = vmatpush.bf16.msra.mxu1 %v2942_v20 }
 0x1c1   :  { %v1338_v31 = vld.sshfl [vmem:[#allocation1] sm:$0xff pattern:$0x73625140]  ;;  %v1339_v32 = vld.sshfl [vmem:[#allocation1 + $0x8] sm:$0xff pattern:$0x73625140] }
 0x1c2   :  { %1596 = vmatmul.bf16.vlgmr.msra.gmra.mxu2 %v1338_v31  ;;  %1609 = vmatmul.bf16.vlgmr.msra.gmra.mxu3 %v1339_v32  ;;  %v1340_v33 = vld.sshfl [vmem:[#allocation1 + $0x10] sm:$0xff pattern:$0x73625140]  ;;  %v1341_v34 = vld.sshfl [vmem:[#allocation1 + $0x18] sm:$0xff pattern:$0x73625140] }
 0x1c3   :  { %1622 = vmatmul.bf16.vlgmr.msrb.gmra.mxu0 %v1340_v33  ;;  %1635 = vmatmul.bf16.vlgmr.msrb.gmra.mxu1 %v1341_v34 }
 0x1c4   :  { %2030 = vmatpush.bf16.msra.mxu2 %v2957_v53 }
 0x1c8   :  { %2031 = vmatpush.bf16.msra.mxu2 %v2956_v55 }
 0x1cc   :  { %2032 = vmatpush.bf16.msra.mxu2 %v2955_v3 }
 0x1d0   :  { %2033 = vmatpush.bf16.msra.mxu2 %v2954_v7 }
 0x1d2   :  { %1648 = vmatmul.bf16.vlgmr.msrb.gmra.mxu2 %v1342_v35 }
 0x1d4   :  { %2034 = vmatpush.bf16.msra.mxu2 %v2953_v17 }
 0x1d8   :  { %2035 = vmatpush.bf16.msra.mxu2 %v2952_v21 }
 0x1dc   :  { %2036 = vmatpush.bf16.msra.mxu2 %v2951_v26 }
 0x1e0   :  { %2037 = vmatpush.bf16.msra.mxu2 %v2950_v27 }
 0x240   :  { %v1623_v30 = vpop.f32.mrf.mxu0  ;;  %v1636_v41 = vpop.f32.mrf.mxu1 }
 0x245   :  { %v1597_v44 = vpop.f32.mrf.mxu2  ;;  %v1610_v45 = vpop.f32.mrf.mxu3 }
 0x246   :  { %v1611_v58 = vadd.f32 %v1610_v45, %v1597_v44 }
 0x248   :  { %v1625_v51 = vpop.f32.mrf.mxu0  ;;  %v1638_v52 = vpop.f32.mrf.mxu1  ;;  %v1624_v0 = vadd.f32 %v1623_v30, %v1611_v58  ;;  %v2965_v58 = vld [vmem:[%s3543_s12 + $0x38] sm:$0xff] }
 0x249   :  { %2121 = vmatpush.bf16.msra.mxu3 %v2965_v58 }
 0x24a   :  { %v1637_v4 = vadd.f32 %v1636_v41, %v1624_v0  ;;  %v2959_v0 = vld [vmem:[%s3543_s12 + $0x8] sm:$0xff] }
 0x24d   :  { %v1599_v59 = vpop.f32.mrf.mxu2  ;;  %v1612_v60 = vpop.f32.mrf.mxu3 }
 0x24e   :  { %v2964_v59 = vld [vmem:[%s3543_s12 + $0x30] sm:$0xff]  ;;  %v2963_v60 = vld [vmem:[%s3543_s12 + $0x28] sm:$0xff] }
 0x24f   :  { %2122 = vmatpush.bf16.msra.mxu3 %v2964_v59 }
 0x253   :  { %2123 = vmatpush.bf16.msra.mxu3 %v2963_v60 }
 0x255   :  { %v1649_v6 = vpop.f32.mrf.mxu2 }
 0x256   :  { %v1650_v8 = vadd.f32 %v1649_v6, %v1637_v4 }
 0x257   :  { %2124 = vmatpush.bf16.msra.mxu3 %v2962_v61 }
 0x258   :  { %v1657_v12 = vmul.f32 %v2975_v5, %v1650_v8 }
 0x25a   :  { %v1662_v13 = vadd.f32 %v2976_v9, %v1657_v12 }
 0x25b   :  { %2125 = vmatpush.bf16.msra.mxu3 %v2961_v62 }
 0x25c   :  { %vm1663_vm11 = vcmp.ge.f32.partialorder %v1662_v13, 0.0  ;;  %v1664_v14 = vmul.f32 0.01, %v1662_v13 }
 0x25d   :  { %v1651_v15 = vpop.f32.mrf.mxu2 }
 0x25e   :  { %v1665_v18 = vsel %vm1663_vm11, %v1662_v13, %v1664_v14 }
 0x25f   :  { %v1666_v19 = vpack.c.bf16 %v1665_v18, %v1665_v18  ;;  %2126 = vmatpush.bf16.msra.mxu3 %v2960_v63  ;;  %v2978_v18 = vld [vmem:[%s3544_s13] ss:$0 sm:$0xff] }
 0x261   :  { %v1668_v22 = vrot.slane %v1666_v19, 2 }
 0x263   :  { %v1671_v23 = vsel %vm124_vm0, %v1666_v19, %v1668_v22  ;;  %v1672_v24 = vsel %vm133_vm2, %v1666_v19, %v1668_v22  ;;  %2127 = vmatpush.bf16.msra.mxu3 %v2959_v0 }
 0x264   :  { %v1674_v25 = vrot.slane %v1672_v24, 2  ;;  %1708 = vst [vmem:[#allocation1] ss:$4 sm:$0xff] %v1671_v23 }
 0x266   :  { %1713 = vst [vmem:[#allocation1 + $0x20] ss:$4 sm:$0xff] %v1674_v25 }
 0x267   :  { %2128 = vmatpush.bf16.msra.mxu3 %v2958_v2 }
 0x26b   :  { %v1709_v28 = vld.sshfl [vmem:[#allocation1] sm:$0xff pattern:$0x73625140] }
 0x26c   :  { %v1716_v29 = vunpack.c.l.b16 %v1709_v28  ;;  %1784 = vst [vmem:[#allocation1] ss:$4 sm:$0xff] %v1671_v23 }
 0x26d   :  { %v1714_v31 = vld.sshfl [vmem:[#allocation1 + $0x20] sm:$0xff pattern:$0x73625140] }
 0x26e   :  { %v1717_v32 = vunpack.c.l.b16 %v1714_v31  ;;  %v1718_v33 = vrot.slane %v1716_v29, 1  ;;  %1788 = vst [vmem:[#allocation1 + $0x20] ss:$4 sm:$0xff] %v1674_v25 }
 0x270   :  { %v1720_v34 = vsel %vm1719_vm12, %v1717_v32, %v1718_v33 }
 0x271   :  { %v1721_v35 = vpack.c.b16 %v1720_v34, %v1720_v34 }
 0x273   :  { %1779 = vmatmul.bf16.vlgmr.msrb.gmra.mxu3 %v1721_v35  ;;  %v1785_v36 = vld.sshfl [vmem:[#allocation1] sm:$0xff pattern:$0x73625140] }
 0x274   :  { %1875 = vst [vmem:[#allocation1] ss:$4 sm:$0xff] %v1671_v23  ;;  %v1791_v39 = vunpack.c.l.b16 %v1785_v36 }
 0x275   :  { %v1789_v37 = vld.sshfl [vmem:[#allocation1 + $0x20] sm:$0xff pattern:$0x73625140] }
 0x276   :  { %v1792_v38 = vunpack.c.l.b16 %v1789_v37  ;;  %1879 = vst [vmem:[#allocation1 + $0x20] ss:$4 sm:$0xff] %v1674_v25 }
 0x278   :  { %v1793_v40 = vrot.slane %v1792_v38, 7 }
 0x27a   :  { %v1794_v30 = vsel %vm1719_vm12, %v1793_v40, %v1791_v39 }
 0x27b   :  { %v1795_v41 = vpack.c.b16 %v1794_v30, %v1794_v30  ;;  %v1876_v42 = vld.sshfl [vmem:[#allocation1] sm:$0xff pattern:$0x73625140] }
 0x27c   :  { %v1882_v43 = vunpack.c.l.b16 %v1876_v42  ;;  %1968 = vst [vmem:[#allocation1] ss:$4 sm:$0xff] %v1671_v23 }
 0x27d   :  { %1853 = vmatmul.bf16.vlgmr.msra.gmra.mxu0 %v1795_v41  ;;  %v1880_v44 = vld.sshfl [vmem:[#allocation1 + $0x20] sm:$0xff pattern:$0x73625140] }
 0x27e   :  { %v1883_v45 = vunpack.c.l.b16 %v1880_v44  ;;  %1972 = vst [vmem:[#allocation1 + $0x20] ss:$4 sm:$0xff] %v1674_v25  ;;  %v1884_v46 = vrot.slane %v1882_v43, 2 }
 0x280   :  { %v1885_v47 = vrot.slane %v1883_v45, 1 }
 0x282   :  { %v1886_v48 = vsel %vm1719_vm12, %v1885_v47, %v1884_v46 }
 0x283   :  { %v1887_v49 = vpack.c.b16 %v1886_v48, %v1886_v48  ;;  %v1969_v50 = vld.sshfl [vmem:[#allocation1] sm:$0xff pattern:$0x73625140] }
 0x284   :  { %v1975_v51 = vunpack.c.l.b16 %v1969_v50 }
 0x285   :  { %1945 = vmatmul.bf16.vlgmr.msra.gmra.mxu1 %v1887_v49  ;;  %v1973_v52 = vld.sshfl [vmem:[#allocation1 + $0x20] sm:$0xff pattern:$0x73625140] }
 0x286   :  { %v1976_v53 = vunpack.c.l.b16 %v1973_v52  ;;  %v1977_v54 = vrot.slane %v1975_v51, 3 }
 0x288   :  { %v1978_v55 = vrot.slane %v1976_v53, 2 }
 0x28a   :  { %v1979_v56 = vsel %vm1719_vm12, %v1978_v55, %v1977_v54 }
 0x28b   :  { %v1980_v57 = vpack.c.b16 %v1979_v56, %v1979_v56 }
 0x28d   :  { %2038 = vmatmul.bf16.vlgmr.msra.gmra.mxu2 %v1980_v57 }
 0x2f6   :  { %v1780_v1 = vpop.f32.mrf.mxu3 }
 0x2fa   :  { %v1854_v3 = vpop.f32.mrf.mxu0 }
 0x2fb   :  { %v1855_v8 = vadd.f32 %v1854_v3, %v1780_v1 }
 0x2fe   :  { %v1782_v4 = vpop.f32.mrf.mxu3 }
 0x302   :  { %v1856_v5 = vpop.f32.mrf.mxu0  ;;  %v1946_v6 = vpop.f32.mrf.mxu1 }
 0x303   :  { %v1950_v9 = vadd.f32 %v1946_v6, %v1855_v8 }
 0x30a   :  { %v1948_v7 = vpop.f32.mrf.mxu1 }
 0x310   :  { %v2039_v11 = vpop.f32.mrf.mxu2 }
 0x311   :  { %v2043_v12 = vadd.f32 %v2039_v11, %v1950_v9 }
 0x313   :  { %v2048_v13 = vadd.f32 %v2977_v10, %v2043_v12 }
 0x315   :  { %vm2049_vm13 = vcmp.ge.f32.partialorder %v2048_v13, 0.0  ;;  %v2050_v14 = vmul.f32 0.01, %v2048_v13 }
 0x317   :  { %v2051_v15 = vsel %vm2049_vm13, %v2048_v13, %v2050_v14 }
 0x318   :  { %v2052_v16 = vpack.c.bf16 %v2051_v15, %v2051_v15  ;;  %v2041_v17 = vpop.f32.mrf.mxu2 }
 0x31a   :  { %2129 = vmatmul.bf16.vlgmr.msra.gmra.mxu3 %v2052_v16 }
 0x39d   :  { %v2130_v19 = vpop.f32.mrf.mxu3 }
 0x39e   :  { %v2131_v20 = vadd.f32 %v2978_v18, %v2130_v19 }
 0x3a0   :  { %2135 = vst.msk [vmem:[#allocation7] sm:$0x3] %vm2134_vm14, %v2131_v20 }
 0x3a1   :  { %2146 = dma.vmem_to_hbm [thread:$0]  %s2142_s29, 32, %s2144_s5, [#allocation4]  }
 0x3a5   :  { %v2132_v21 = vpop.f32.mrf.mxu3 }
 0x3a6   :  { %3055 = dma.done.wait [#allocation4], 32  }
 0x3a7   :  { %3056 = vsyncadd [#allocation4], 4294967264 }
 0x3a8   :  { %2151 = vsyncpa [#allocation3], 1 }
 0x3a9   :  { %2152 = vsyncpa [#allocation6], 1 }
 0x3aa   :  { %2153 = vsyncpa [#allocation4], 1 }

</bundles_post_ra>
